<compile_context>
chip_gen: v7x
topology: tpu7x:2x2x1
jax: 0.10.0
libtpu: 0.0.40
codegen_flags: <defaults>
</compile_context>

<pallas_src>
from functools import partial

import numpy as np
import jax
import jax.numpy as jnp
from jax.experimental import pallas as pl
from jax.experimental.pallas import tpu as pltpu


# ----------------------------- host-side helpers --------------------------- #

def _sym_index(n):
    """(n, n) index into the packed m-vector for each (row, col) entry."""
    m = (n * n + n) // 2
    idx = np.zeros((n, n), np.int32)
    d = np.arange(n)
    idx[d, d] = d
    r, c = np.tril_indices(n, k=-1)        # row-major, same order as torch.tril_indices
    off = np.arange(m - n) + n
    idx[r, c] = off
    idx[c, r] = off
    return idx


def vec2symmat(vec, n):
    """(..., m) -> (..., n, n) symmetric via a single gather (matches torch)."""
    idx = jnp.asarray(_sym_index(n).reshape(-1))
    return jnp.take(vec, idx, axis=-1).reshape(vec.shape[:-1] + (n, n))


def make_dUdx(n):
    """dUdx reshaped to (n*n, m) — only used by the pure-JAX reference."""
    m = (n * n + n) // 2
    dUdx = np.zeros((n, n, m), np.float32)
    diag = np.arange(n)
    dUdx[diag, diag, diag] = 1.0
    r, c = np.tril_indices(n, k=-1)
    off = np.arange(m - n) + n
    dUdx[c, r, off] = 1.0
    dUdx[r, c, off] = 1.0
    return dUdx.reshape(n * n, m)


# ------------------------------- Pallas kernel ----------------------------- #

def spd_exp_kernel(v_ref, e_ref, dxp_ref, out_ref, dout_ref, *, sym_idx):
    """SPD exp + Daleckii–Krein derivative, batch on (sublane, lane).

    v_ref   : (n, n, S, L)    eigenvectors V[row, eig]
    e_ref   : (n, S, L)       eigenvalues
    dxp_ref : (k, m, S, L)    packed triangular dx (m = n(n+1)/2)
    out_ref : (n, n, S, L)    matrix exponential
    dout_ref: (k, n, n, S, L) directional derivatives
    """
    n = v_ref.shape[0]
    S, L = v_ref.shape[-2], v_ref.shape[-1]
    k = dxp_ref.shape[0]

    V = v_ref[...]                       # (n, n, S, L)
    e = e_ref[...]                       # (n, S, L)
    expe = jnp.exp(e)                    # (n, S, L)

    # Hoisted broadcast views (reused by every contraction / k iteration).
    V_pl = V[:, :, None]                 # value V[p, l] at axes (p, l, ·)
    V_qm = V[None, :, :]                 # value V[q, m] at axes (·, q, m)
    V_il = V[:, None, :]                 # value V[i, l] at axes (i, ·, l)
    expe_l = expe[None, None]            # (1, 1, n, S, L)

    # out[i, j] = sum_l V[i, l] * exp(e_l) * V[j, l]   (reduce over a leading axis)
    out_ref[...] = jnp.sum(V_il * V_qm * expe_l, axis=2)

    # Loewner / divided-difference matrix R[l, m]; diagonal overwritten with exp(e_l).
    d_e = e[:, None] - e[None, :]                       # (n, n, S, L)  e_l - e_m
    d_x = expe[:, None] - expe[None, :]                 # exp(e_l) - exp(e_m)
    nz = d_e != 0.0
    R = jnp.where(nz, d_x / jnp.where(nz, d_e, 1.0), 0.0)
    ii = jax.lax.broadcasted_iota(jnp.int32, (n, n, S, L), 0)
    jj = jax.lax.broadcasted_iota(jnp.int32, (n, n, S, L), 1)
    R = jnp.where(ii == jj, expe[:, None], R)
    # TODO(synk): exact `!= 0` guard matches torch's comp_R; near-degenerate
    # eigenvalues still suffer f32 cancellation, same as the reference.

    # Daleckii–Krein: dOut_k = V (R ∘ (Vᵀ dU_k V)) Vᵀ.  Every contraction
    # reduces over a leading axis -> pure VPU; no MXU/XLU for tiny n.
    # NOTE: for large k, move k onto the grid (streaming dU/dout); k is small
    # for this module so the unrolled loop is cheapest.
    for kk in range(k):
        dxk = dxp_ref[kk]                                # (m, S, L)
        # Expand packed dx to the symmetric dU rows with static copies.
        dU = jnp.stack(
            [jnp.stack([dxk[sym_idx[p][q]] for q in range(n)], axis=0)
             for p in range(n)], axis=0)                 # (n, n, S, L)
        # T1[l, q] = sum_p V[p, l] dU[p, q]
        T1 = jnp.sum(V_pl * dU[:, None, :], axis=0)
        # M[l, m]  = sum_q T1[l, q] V[q, m]
        M = jnp.sum(T1[:, :, None] * V_qm, axis=1)
        H = R * M
        # T2[i, m] = sum_l V[i, l] H[l, m]
        T2 = jnp.sum(V_pl * H[None, :, :], axis=1)
        # dout[i, j] = sum_m T2[i, m] V[j, m]
        dout_ref[kk] = jnp.sum(T2[:, None, :] * V_qm, axis=2)


# ------------------------------- host wrapper ------------------------------ #

def spd_exp_layer(x, dx, n_dof):
    n = n_dof
    bs, m = x.shape
    k = dx.shape[-1]
    assert m == (n * n + n) // 2
    LANE = 128

    x32 = x.astype(jnp.float32)
    dx32 = dx.astype(jnp.float32)

    # Pad the batch up-front on the small packed vectors (cheap; no separate
    # pad pass over the larger post-eigh arrays).  Padded rows are zeros ->
    # U = 0 -> eigh / exp stay finite; they are sliced off at the end.
    b_pad = int(pl.cdiv(bs, LANE)) * LANE
    if b_pad != bs:
        x32 = jnp.pad(x32, ((0, b_pad - bs), (0, 0)))
        dx32 = jnp.pad(dx32, ((0, b_pad - bs), (0, 0), (0, 0)))

    # vec -> symmetric matrix as a single gather (no scatter passes).
    sym_idx = _sym_index(n)
    U = jnp.take(x32, jnp.asarray(sym_idx.reshape(-1)), axis=-1).reshape(b_pad, n, n)

    # TODO(synk): symmetric eigendecomposition has no Pallas equivalent; JAX glue.
    e, v = jnp.linalg.eigh(U)
    e = e.astype(jnp.float32)
    v = v.astype(jnp.float32)

    # Batch-last layout with the batch folded onto (sublane, lane) = (B128, 128).
    B128 = b_pad // LANE
    vl = jnp.transpose(v, (1, 2, 0)).reshape(n, n, B128, LANE)     # V[row, eig, b]
    el = jnp.transpose(e, (1, 0)).reshape(n, B128, LANE)           # eigenvalues
    dxl = jnp.transpose(dx32, (2, 1, 0)).reshape(k, m, B128, LANE)  # packed triangular dx

    # Sublane tile: as large as a conservative VMEM budget allows (sized for
    # v7x's 64 MiB physical VMEM), with >= 2 grid steps when the batch is big
    # enough so both v7x TensorCores get work via dimension_semantics.
    rows_io = 2 * (n * n + n + k * m + n * n + k * n * n)      # double-buffered I/O
    rows_tmp = 4 * n * n * n + 8 * n * n + 3 * k * n * n       # rough in-kernel temps
    per_sub_bytes = 4 * LANE * (rows_io + rows_tmp)
    budget = 20 * 1024 * 1024
    sub_cap = max(8, min(64, (budget // per_sub_bytes) // 8 * 8))
    if B128 <= 8:
        sub_tile = B128                                        # tiny batch: one block
    else:
        sub_tile = max(8, min(sub_cap, (B128 // 2) // 8 * 8))
    grid = (int(pl.cdiv(B128, sub_tile)),)

    kernel = partial(spd_exp_kernel,
                     sym_idx=tuple(tuple(int(q) for q in row) for row in sym_idx))

    out_l, dout_l = pl.pallas_call(
        kernel,
        out_shape=(jax.ShapeDtypeStruct((n, n, B128, LANE), jnp.float32),
                   jax.ShapeDtypeStruct((k, n, n, B128, LANE), jnp.float32)),
        grid_spec=pltpu.PrefetchScalarGridSpec(
            num_scalar_prefetch=0,
            grid=grid,
            in_specs=[
                pl.BlockSpec((n, n, sub_tile, LANE), lambda b: (0, 0, b, 0)),     # V
                pl.BlockSpec((n, sub_tile, LANE), lambda b: (0, b, 0)),           # e
                pl.BlockSpec((k, m, sub_tile, LANE), lambda b: (0, 0, b, 0)),     # dx packed
            ],
            out_specs=[
                pl.BlockSpec((n, n, sub_tile, LANE), lambda b: (0, 0, b, 0)),
                pl.BlockSpec((k, n, n, sub_tile, LANE), lambda b: (0, 0, 0, b, 0)),
            ]),
        compiler_params=pltpu.CompilerParams(
            dimension_semantics=("parallel",),
            vmem_limit_bytes=32 * 1024 * 1024),
    )(vl, el, dxl)

    # Back to the module's (batch, n, n[, k]) layout; padded rows sliced off.
    out = jnp.transpose(out_l.reshape(n, n, b_pad), (2, 0, 1))[:bs]
    dout = jnp.transpose(dout_l.reshape(k, n, n, b_pad), (3, 1, 2, 0))[:bs]
    return out, dout


# ------------------------------ pure-JAX reference ------------------------- #
# Mirrors the original PyTorch module (kron / diag_embed / dUdx formulation).

def reference(x, dx, n_dof):
    n = n_dof
    bs, m = x.shape
    dUdx2d = jnp.asarray(make_dUdx(n))
    U = vec2symmat(x, n)
    e, v = jnp.linalg.eigh(U)
    exp_e = jnp.exp(e)
    out = jnp.einsum('bij,bj,bkj->bik', v, exp_e, v)
    P = jnp.einsum('bij,bkl->bikjl', v, v).reshape(bs, n * n, n * n)
    b_diff = e[:, :, None] - e[:, None, :]
    exp_diff = exp_e[:, :, None] - exp_e[:, None, :]
    nz = b_diff != 0
    R = jnp.where(nz, exp_diff / jnp.where(nz, b_diff, 1.0), 0.0)
    diag = jnp.arange(n)
    R = R.at[:, diag, diag].set(exp_e)
    d = jnp.swapaxes(R, -1, -2).reshape(bs, n * n)
    D = jax.vmap(jnp.diag)(d)
    der = P @ D @ jnp.swapaxes(P, -1, -2)
    der = der @ dUdx2d[None]
    der = jnp.swapaxes(der.reshape(bs, n, n, m), 1, 2)
    dout = der @ dx[:, None]
    return out, dout


# ----------------------------------- main ----------------------------------- #

if __name__ == "__main__":
    n_dof = 4
    m = (n_dof * n_dof + n_dof) // 2          # 10

    # Required small case: batch=2, single direction.
    bs, k = 2, 1
    kx, kd = jax.random.split(jax.random.PRNGKey(0))
    x = jax.random.normal(kx, (bs, m), jnp.float32)
    dx = jax.random.normal(kd, (bs, m, k), jnp.float32)

    out, dout = jax.block_until_ready(spd_exp_layer(x, dx, n_dof))
    ref_out, ref_dout = reference(x, dx, n_dof)
    np.testing.assert_allclose(np.asarray(out), np.asarray(ref_out),
                               rtol=1e-4, atol=1e-4)
    np.testing.assert_allclose(np.asarray(dout), np.asarray(ref_dout),
                               rtol=1e-4, atol=1e-4)

    # Second case: exercises batch padding, sublane folding and k > 1.
    bs2, k2 = 300, 2
    kx2, kd2 = jax.random.split(jax.random.PRNGKey(1))
    x2 = jax.random.normal(kx2, (bs2, m), jnp.float32)
    dx2 = jax.random.normal(kd2, (bs2, m, k2), jnp.float32)

    out2, dout2 = jax.block_until_ready(spd_exp_layer(x2, dx2, n_dof))
    ref_out2, ref_dout2 = reference(x2, dx2, n_dof)
    np.testing.assert_allclose(np.asarray(out2), np.asarray(ref_out2),
                               rtol=1e-3, atol=1e-3)
    np.testing.assert_allclose(np.asarray(dout2), np.asarray(ref_dout2),
                               rtol=1e-3, atol=1e-3)

    print("KERNEL_OK")
</pallas_src>

<mosaic_0001>
module attributes {stable_mosaic.version = 11 : i64} {
  func.func @spd_exp_kernel(%arg0: i32, %arg1: memref<4x4x1x128xf32, #tpu.memory_space<vmem>>, %arg2: memref<4x1x128xf32, #tpu.memory_space<vmem>>, %arg3: memref<1x10x1x128xf32, #tpu.memory_space<vmem>>, %arg4: memref<4x4x1x128xf32, #tpu.memory_space<vmem>>, %arg5: memref<1x4x4x1x128xf32, #tpu.memory_space<vmem>>) attributes {dimension_semantics = [#tpu.dimension_semantics<parallel>], iteration_bounds = array<i64: 1>, scalar_prefetch = 0 : i64, scratch_operands = 0 : i64, tpu.core_type = #tpu.core_type<tc>, window_params = [{transform_indices = @transform_0, window_bounds = array<i64: 4, 4, 1, 128>}, {transform_indices = @transform_1, window_bounds = array<i64: 4, 1, 128>}, {transform_indices = @transform_2, window_bounds = array<i64: 1, 10, 1, 128>}, {transform_indices = @transform_3, window_bounds = array<i64: 4, 4, 1, 128>}, {transform_indices = @transform_4, window_bounds = array<i64: 1, 4, 4, 1, 128>}]} {
    %c0 = arith.constant 0 : index
    %c0_0 = arith.constant 0 : index
    %c0_1 = arith.constant 0 : index
    %c0_2 = arith.constant 0 : index
    %0 = vector.load %arg1[%c0, %c0_0, %c0_1, %c0_2] : memref<4x4x1x128xf32, #tpu.memory_space<vmem>>, vector<4x4x1x128xf32>
    %c0_3 = arith.constant 0 : index
    %c0_4 = arith.constant 0 : index
    %c0_5 = arith.constant 0 : index
    %1 = vector.load %arg2[%c0_3, %c0_4, %c0_5] : memref<4x1x128xf32, #tpu.memory_space<vmem>>, vector<4x1x128xf32>
    %2 = math.exp %1 : vector<4x1x128xf32>
    %3 = vector.shape_cast %0 : vector<4x4x1x128xf32> to vector<4x4x1x1x128xf32>
    %4 = vector.shape_cast %0 : vector<4x4x1x128xf32> to vector<1x4x4x1x128xf32>
    %5 = vector.shape_cast %0 : vector<4x4x1x128xf32> to vector<4x1x4x1x128xf32>
    %6 = vector.shape_cast %2 : vector<4x1x128xf32> to vector<1x1x4x1x128xf32>
    %7 = vector.broadcast %5 : vector<4x1x4x1x128xf32> to vector<4x4x4x1x128xf32>
    %8 = vector.broadcast %4 : vector<1x4x4x1x128xf32> to vector<4x4x4x1x128xf32>
    %9 = arith.mulf %7, %8 : vector<4x4x4x1x128xf32>
    %10 = vector.broadcast %6 : vector<1x1x4x1x128xf32> to vector<4x4x4x1x128xf32>
    %11 = arith.mulf %9, %10 : vector<4x4x4x1x128xf32>
    %cst = arith.constant dense<0.000000e+00> : vector<4x4x1x128xf32>
    %12 = vector.multi_reduction <add>, %11, %cst [2] : vector<4x4x4x1x128xf32> to vector<4x4x1x128xf32>
    %c0_6 = arith.constant 0 : index
    %c0_7 = arith.constant 0 : index
    %c0_8 = arith.constant 0 : index
    %c0_9 = arith.constant 0 : index
    %13 = vector.load %arg4[%c0_6, %c0_7, %c0_8, %c0_9] : memref<4x4x1x128xf32, #tpu.memory_space<vmem>>, vector<4x4x1x128xf32>
    tpu.vector_store %arg4[%c0_6, %c0_7, %c0_8, %c0_9], %12 {strides = array<i32>} : memref<4x4x1x128xf32, #tpu.memory_space<vmem>>, vector<4x4x1x128xf32>,
    %14 = vector.shape_cast %1 : vector<4x1x128xf32> to vector<4x1x1x128xf32>
    %15 = vector.shape_cast %1 : vector<4x1x128xf32> to vector<1x4x1x128xf32>
    %16 = vector.broadcast %14 : vector<4x1x1x128xf32> to vector<4x4x1x128xf32>
    %17 = vector.broadcast %15 : vector<1x4x1x128xf32> to vector<4x4x1x128xf32>
    %18 = arith.subf %16, %17 : vector<4x4x1x128xf32>
    %19 = vector.shape_cast %2 : vector<4x1x128xf32> to vector<4x1x1x128xf32>
    %20 = vector.shape_cast %2 : vector<4x1x128xf32> to vector<1x4x1x128xf32>
    %21 = vector.broadcast %19 : vector<4x1x1x128xf32> to vector<4x4x1x128xf32>
    %22 = vector.broadcast %20 : vector<1x4x1x128xf32> to vector<4x4x1x128xf32>
    %23 = arith.subf %21, %22 : vector<4x4x1x128xf32>
    %cst_10 = arith.constant 0.000000e+00 : f32
    %24 = vector.broadcast %cst_10 : f32 to vector<4x4x1x128xf32>
    %25 = arith.cmpf one, %18, %24 : vector<4x4x1x128xf32>
    %cst_11 = arith.constant 1.000000e+00 : f32
    %26 = vector.broadcast %cst_11 : f32 to vector<4x4x1x128xf32>
    %27 = arith.select %25, %18, %26 : vector<4x4x1x128xi1>, vector<4x4x1x128xf32>
    %28 = arith.divf %23, %27 : vector<4x4x1x128xf32>
    %cst_12 = arith.constant 0.000000e+00 : f32
    %29 = vector.broadcast %cst_12 : f32 to vector<4x4x1x128xf32>
    %30 = arith.select %25, %28, %29 : vector<4x4x1x128xi1>, vector<4x4x1x128xf32>
    %31 = tpu.iota {dimensions = array<i32: 0>} : vector<4x4x1x128xi32>
    %32 = tpu.iota {dimensions = array<i32: 1>} : vector<4x4x1x128xi32>
    %33 = arith.cmpi eq, %31, %32 : vector<4x4x1x128xi32>
    %34 = vector.shape_cast %2 : vector<4x1x128xf32> to vector<4x1x1x128xf32>
    %35 = vector.shape_cast %34 : vector<4x1x1x128xf32> to vector<4x1x1x128xf32>
    %36 = vector.broadcast %35 : vector<4x1x1x128xf32> to vector<4x4x1x128xf32>
    %37 = arith.select %33, %36, %30 : vector<4x4x1x128xi1>, vector<4x4x1x128xf32>
    %c0_13 = arith.constant 0 : index
    %c0_14 = arith.constant 0 : index
    %c0_15 = arith.constant 0 : index
    %c0_16 = arith.constant 0 : index
    %38 = vector.load %arg3[%c0_13, %c0_14, %c0_15, %c0_16] : memref<1x10x1x128xf32, #tpu.memory_space<vmem>>, vector<1x10x1x128xf32>
    %39 = vector.shape_cast %38 : vector<1x10x1x128xf32> to vector<10x1x128xf32>
    %40 = vector.extract_strided_slice %39 {offsets = [0, 0, 0], sizes = [1, 1, 128], strides = [1, 1, 1]} : vector<10x1x128xf32> to vector<1x1x128xf32>
    %41 = vector.shape_cast %40 : vector<1x1x128xf32> to vector<1x128xf32>
    %42 = vector.extract_strided_slice %39 {offsets = [4, 0, 0], sizes = [1, 1, 128], strides = [1, 1, 1]} : vector<10x1x128xf32> to vector<1x1x128xf32>
    %43 = vector.shape_cast %42 : vector<1x1x128xf32> to vector<1x128xf32>
    %44 = vector.extract_strided_slice %39 {offsets = [5, 0, 0], sizes = [1, 1, 128], strides = [1, 1, 1]} : vector<10x1x128xf32> to vector<1x1x128xf32>
    %45 = vector.shape_cast %44 : vector<1x1x128xf32> to vector<1x128xf32>
    %46 = vector.extract_strided_slice %39 {offsets = [7, 0, 0], sizes = [1, 1, 128], strides = [1, 1, 1]} : vector<10x1x128xf32> to vector<1x1x128xf32>
    %47 = vector.shape_cast %46 : vector<1x1x128xf32> to vector<1x128xf32>
    %48 = vector.shape_cast %41 : vector<1x128xf32> to vector<1x1x128xf32>
    %49 = vector.shape_cast %43 : vector<1x128xf32> to vector<1x1x128xf32>
    %50 = vector.shape_cast %45 : vector<1x128xf32> to vector<1x1x128xf32>
    %51 = vector.shape_cast %47 : vector<1x128xf32> to vector<1x1x128xf32>
    %52 = tpu.concatenate %48, %49, %50, %51 in 0 : vector<1x1x128xf32>, vector<1x1x128xf32>, vector<1x1x128xf32>, vector<1x1x128xf32> -> vector<4x1x128xf32>
    %53 = vector.extract_strided_slice %39 {offsets = [4, 0, 0], sizes = [1, 1, 128], strides = [1, 1, 1]} : vector<10x1x128xf32> to vector<1x1x128xf32>
    %54 = vector.shape_cast %53 : vector<1x1x128xf32> to vector<1x128xf32>
    %55 = vector.extract_strided_slice %39 {offsets = [1, 0, 0], sizes = [1, 1, 128], strides = [1, 1, 1]} : vector<10x1x128xf32> to vector<1x1x128xf32>
    %56 = vector.shape_cast %55 : vector<1x1x128xf32> to vector<1x128xf32>
    %57 = vector.extract_strided_slice %39 {offsets = [6, 0, 0], sizes = [1, 1, 128], strides = [1, 1, 1]} : vector<10x1x128xf32> to vector<1x1x128xf32>
    %58 = vector.shape_cast %57 : vector<1x1x128xf32> to vector<1x128xf32>
    %59 = vector.extract_strided_slice %39 {offsets = [8, 0, 0], sizes = [1, 1, 128], strides = [1, 1, 1]} : vector<10x1x128xf32> to vector<1x1x128xf32>
    %60 = vector.shape_cast %59 : vector<1x1x128xf32> to vector<1x128xf32>
    %61 = vector.shape_cast %54 : vector<1x128xf32> to vector<1x1x128xf32>
    %62 = vector.shape_cast %56 : vector<1x128xf32> to vector<1x1x128xf32>
    %63 = vector.shape_cast %58 : vector<1x128xf32> to vector<1x1x128xf32>
    %64 = vector.shape_cast %60 : vector<1x128xf32> to vector<1x1x128xf32>
    %65 = tpu.concatenate %61, %62, %63, %64 in 0 : vector<1x1x128xf32>, vector<1x1x128xf32>, vector<1x1x128xf32>, vector<1x1x128xf32> -> vector<4x1x128xf32>
    %66 = vector.extract_strided_slice %39 {offsets = [5, 0, 0], sizes = [1, 1, 128], strides = [1, 1, 1]} : vector<10x1x128xf32> to vector<1x1x128xf32>
    %67 = vector.shape_cast %66 : vector<1x1x128xf32> to vector<1x128xf32>
    %68 = vector.extract_strided_slice %39 {offsets = [6, 0, 0], sizes = [1, 1, 128], strides = [1, 1, 1]} : vector<10x1x128xf32> to vector<1x1x128xf32>
    %69 = vector.shape_cast %68 : vector<1x1x128xf32> to vector<1x128xf32>
    %70 = vector.extract_strided_slice %39 {offsets = [2, 0, 0], sizes = [1, 1, 128], strides = [1, 1, 1]} : vector<10x1x128xf32> to vector<1x1x128xf32>
    %71 = vector.shape_cast %70 : vector<1x1x128xf32> to vector<1x128xf32>
    %72 = vector.extract_strided_slice %39 {offsets = [9, 0, 0], sizes = [1, 1, 128], strides = [1, 1, 1]} : vector<10x1x128xf32> to vector<1x1x128xf32>
    %73 = vector.shape_cast %72 : vector<1x1x128xf32> to vector<1x128xf32>
    %74 = vector.shape_cast %67 : vector<1x128xf32> to vector<1x1x128xf32>
    %75 = vector.shape_cast %69 : vector<1x128xf32> to vector<1x1x128xf32>
    %76 = vector.shape_cast %71 : vector<1x128xf32> to vector<1x1x128xf32>
    %77 = vector.shape_cast %73 : vector<1x128xf32> to vector<1x1x128xf32>
    %78 = tpu.concatenate %74, %75, %76, %77 in 0 : vector<1x1x128xf32>, vector<1x1x128xf32>, vector<1x1x128xf32>, vector<1x1x128xf32> -> vector<4x1x128xf32>
    %79 = vector.extract_strided_slice %39 {offsets = [7, 0, 0], sizes = [1, 1, 128], strides = [1, 1, 1]} : vector<10x1x128xf32> to vector<1x1x128xf32>
    %80 = vector.shape_cast %79 : vector<1x1x128xf32> to vector<1x128xf32>
    %81 = vector.extract_strided_slice %39 {offsets = [8, 0, 0], sizes = [1, 1, 128], strides = [1, 1, 1]} : vector<10x1x128xf32> to vector<1x1x128xf32>
    %82 = vector.shape_cast %81 : vector<1x1x128xf32> to vector<1x128xf32>
    %83 = vector.extract_strided_slice %39 {offsets = [9, 0, 0], sizes = [1, 1, 128], strides = [1, 1, 1]} : vector<10x1x128xf32> to vector<1x1x128xf32>
    %84 = vector.shape_cast %83 : vector<1x1x128xf32> to vector<1x128xf32>
    %85 = vector.extract_strided_slice %39 {offsets = [3, 0, 0], sizes = [1, 1, 128], strides = [1, 1, 1]} : vector<10x1x128xf32> to vector<1x1x128xf32>
    %86 = vector.shape_cast %85 : vector<1x1x128xf32> to vector<1x128xf32>
    %87 = vector.shape_cast %80 : vector<1x128xf32> to vector<1x1x128xf32>
    %88 = vector.shape_cast %82 : vector<1x128xf32> to vector<1x1x128xf32>
    %89 = vector.shape_cast %84 : vector<1x128xf32> to vector<1x1x128xf32>
    %90 = vector.shape_cast %86 : vector<1x128xf32> to vector<1x1x128xf32>
    %91 = tpu.concatenate %87, %88, %89, %90 in 0 : vector<1x1x128xf32>, vector<1x1x128xf32>, vector<1x1x128xf32>, vector<1x1x128xf32> -> vector<4x1x128xf32>
    %92 = vector.shape_cast %52 : vector<4x1x128xf32> to vector<1x4x1x128xf32>
    %93 = vector.shape_cast %65 : vector<4x1x128xf32> to vector<1x4x1x128xf32>
    %94 = vector.shape_cast %78 : vector<4x1x128xf32> to vector<1x4x1x128xf32>
    %95 = vector.shape_cast %91 : vector<4x1x128xf32> to vector<1x4x1x128xf32>
    %96 = tpu.concatenate %92, %93, %94, %95 in 0 : vector<1x4x1x128xf32>, vector<1x4x1x128xf32>, vector<1x4x1x128xf32>, vector<1x4x1x128xf32> -> vector<4x4x1x128xf32>
    %97 = vector.shape_cast %96 : vector<4x4x1x128xf32> to vector<4x1x4x1x128xf32>
    %98 = vector.broadcast %3 : vector<4x4x1x1x128xf32> to vector<4x4x4x1x128xf32>
    %99 = vector.broadcast %97 : vector<4x1x4x1x128xf32> to vector<4x4x4x1x128xf32>
    %100 = arith.mulf %98, %99 : vector<4x4x4x1x128xf32>
    %cst_17 = arith.constant dense<0.000000e+00> : vector<4x4x1x128xf32>
    %101 = vector.multi_reduction <add>, %100, %cst_17 [0] : vector<4x4x4x1x128xf32> to vector<4x4x1x128xf32>
    %102 = vector.shape_cast %101 : vector<4x4x1x128xf32> to vector<4x4x1x1x128xf32>
    %103 = vector.broadcast %102 : vector<4x4x1x1x128xf32> to vector<4x4x4x1x128xf32>
    %104 = vector.broadcast %4 : vector<1x4x4x1x128xf32> to vector<4x4x4x1x128xf32>
    %105 = arith.mulf %103, %104 : vector<4x4x4x1x128xf32>
    %cst_18 = arith.constant dense<0.000000e+00> : vector<4x4x1x128xf32>
    %106 = vector.multi_reduction <add>, %105, %cst_18 [1] : vector<4x4x4x1x128xf32> to vector<4x4x1x128xf32>
    %107 = arith.mulf %37, %106 : vector<4x4x1x128xf32>
    %108 = vector.shape_cast %107 : vector<4x4x1x128xf32> to vector<1x4x4x1x128xf32>
    %109 = vector.broadcast %3 : vector<4x4x1x1x128xf32> to vector<4x4x4x1x128xf32>
    %110 = vector.broadcast %108 : vector<1x4x4x1x128xf32> to vector<4x4x4x1x128xf32>
    %111 = arith.mulf %109, %110 : vector<4x4x4x1x128xf32>
    %cst_19 = arith.constant dense<0.000000e+00> : vector<4x4x1x128xf32>
    %112 = vector.multi_reduction <add>, %111, %cst_19 [1] : vector<4x4x4x1x128xf32> to vector<4x4x1x128xf32>
    %113 = vector.shape_cast %112 : vector<4x4x1x128xf32> to vector<4x1x4x1x128xf32>
    %114 = vector.broadcast %113 : vector<4x1x4x1x128xf32> to vector<4x4x4x1x128xf32>
    %115 = vector.broadcast %4 : vector<1x4x4x1x128xf32> to vector<4x4x4x1x128xf32>
    %116 = arith.mulf %114, %115 : vector<4x4x4x1x128xf32>
    %cst_20 = arith.constant dense<0.000000e+00> : vector<4x4x1x128xf32>
    %117 = vector.multi_reduction <add>, %116, %cst_20 [2] : vector<4x4x4x1x128xf32> to vector<4x4x1x128xf32>
    %c0_21 = arith.constant 0 : index
    %c0_22 = arith.constant 0 : index
    %c0_23 = arith.constant 0 : index
    %c0_24 = arith.constant 0 : index
    %c0_25 = arith.constant 0 : index
    %118 = vector.load %arg5[%c0_21, %c0_22, %c0_23, %c0_24, %c0_25] : memref<1x4x4x1x128xf32, #tpu.memory_space<vmem>>, vector<1x4x4x1x128xf32>
    %119 = vector.shape_cast %118 : vector<1x4x4x1x128xf32> to vector<4x4x1x128xf32>
    %120 = vector.shape_cast %117 : vector<4x4x1x128xf32> to vector<1x4x4x1x128xf32>
    tpu.vector_store %arg5[%c0_21, %c0_22, %c0_23, %c0_24, %c0_25], %120 {strides = array<i32>} : memref<1x4x4x1x128xf32, #tpu.memory_space<vmem>>, vector<1x4x4x1x128xf32>,
    return
  }
  func.func @transform_0(%arg0: i32) -> (i32, i32, i32, i32) {
    %c0_i32 = arith.constant 0 : i32
    %c0_i32_0 = arith.constant 0 : i32
    %c0_i32_1 = arith.constant 0 : i32
    %c0_i32_2 = arith.constant 0 : i32
    return %c0_i32, %c0_i32_0, %arg0, %c0_i32_1 : i32, i32, i32, i32
  }
  func.func @transform_1(%arg0: i32) -> (i32, i32, i32) {
    %c0_i32 = arith.constant 0 : i32
    %c0_i32_0 = arith.constant 0 : i32
    %c0_i32_1 = arith.constant 0 : i32
    return %c0_i32, %arg0, %c0_i32_0 : i32, i32, i32
  }
  func.func @transform_2(%arg0: i32) -> (i32, i32, i32, i32) {
    %c0_i32 = arith.constant 0 : i32
    %c0_i32_0 = arith.constant 0 : i32
    %c0_i32_1 = arith.constant 0 : i32
    %c0_i32_2 = arith.constant 0 : i32
    return %c0_i32, %c0_i32_0, %arg0, %c0_i32_1 : i32, i32, i32, i32
  }
  func.func @transform_3(%arg0: i32) -> (i32, i32, i32, i32) {
    %c0_i32 = arith.constant 0 : i32
    %c0_i32_0 = arith.constant 0 : i32
    %c0_i32_1 = arith.constant 0 : i32
    %c0_i32_2 = arith.constant 0 : i32
    return %c0_i32, %c0_i32_0, %arg0, %c0_i32_1 : i32, i32, i32, i32
  }
  func.func @transform_4(%arg0: i32) -> (i32, i32, i32, i32, i32) {
    %c0_i32 = arith.constant 0 : i32
    %c0_i32_0 = arith.constant 0 : i32
    %c0_i32_1 = arith.constant 0 : i32
    %c0_i32_2 = arith.constant 0 : i32
    %c0_i32_3 = arith.constant 0 : i32
    return %c0_i32, %c0_i32_0, %c0_i32_1, %arg0, %c0_i32_2 : i32, i32, i32, i32, i32
  }
}

</mosaic_0001>

<bundles_post_ra>
// kernel: tpu_custom_call.1
= control target key start
LH: loop header
LB: loop body
LE: loop exit
PB: predicated region body
PF: predicated region fallthrough
CT: control target
= control target key end

     0   :  { %10 = vsyncpa [#allocation3], 0  ;;  %s3162_s0 = inlined_call_operand.hbm [shape: f32[4,4,1,128], index: 0, kind: input, shape index: {}]   ;;  %s3163_s1 = inlined_call_operand.hbm [shape: f32[4,1,128], index: 1, kind: input, shape index: {}]   ;;  %s3164_s2 = inlined_call_operand.hbm [shape: f32[1,10,1,128], index: 2, kind: input, shape index: {}]   ;;  %s3165_s3 = inlined_call_operand.hbm [shape: f32[4,4,1,128], index: 3, kind: output, shape index: {0}]   ;;  %s3166_s4 = inlined_call_operand.hbm [shape: f32[1,4,4,1,128], index: 4, kind: output, shape index: {1}]  }
   0x1   :  { %11 = vsyncpa [#allocation6], 0 }
   0x2   :  { %12 = vsyncpa [#allocation4], 0 }
   0x3   :  { %13 = vsyncpa [#allocation10], 0  ;;  %s1335_s15 = smov [#allocation5]   ;;  %s1336_s17 = smov [#allocation2]  }
   0x4   :  { %s31_s16 = sshll.u32 %s1335_s15, 4  ;;  %s19_s18 = sshll.u32 %s1336_s17, 4  ;;  %s32_s16 = int_to_ptr.vmem [resolvable:$true] %s31_s16  ;;  %s1367_s18 = int_to_ptr.vmem [resolvable:$true] %s19_s18 }
   0x5   :  { %s1217_s21 = scalar_lea.hbm %s3163_s1, 64 }
   0x6   :  { %p1218_p0 = scmp.ne.s32.totalorder %s3163_s1, %s1217_s21  ;;  %p1221_p1 = scmp.lt.u32.totalorder %s1217_s21, %s3163_s1 }
   0x8   :  { %p1223_p2 = pnand %p1221_p1, %p1218_p0 }
   0xa   :  { %1226 = shalt.err (!%p1223_p2)
}
   0xb   :  { %s1227_s26 = scalar_lea.vmem %s32_s16, 64  ;;  %p1232_p4 = scmp.lt.s32.totalorder %s32_s16, %s32_s16 }
   0xc   :  { %p1228_p3 = scmp.ne.s32.totalorder %s32_s16, %s1227_s26  ;;  %p1233_p5 = scmp.lt.s32.totalorder %s1227_s26, %s1227_s26 }
   0xe   :  { %p1234_p6 = por %p1233_p5, %p1232_p4 }
  0x10   :  { %p1235_p7 = pnand %p1234_p6, %p1228_p3 }
  0x12   :  { %1238 = shalt.err (!%p1235_p7)
}
  0x13   :  { %s1337_s27 = smov 16   ;;  %s1338_s28 = smov 1  }
  0x14   :  { %37 = dma.hbm_to_vmem [thread:$0]  %s3163_s1, 64, %s32_s16, [#allocation6], %s1337_s27, %s1337_s27, %s1338_s28  }
  0x15   :  { %s1239_s7 = scalar_lea.hbm %s3162_s0, 256 }
  0x16   :  { %p1240_p8 = scmp.ne.s32.totalorder %s3162_s0, %s1239_s7  ;;  %p1243_p9 = scmp.lt.u32.totalorder %s1239_s7, %s3162_s0 }
  0x18   :  { %p1245_p10 = pnand %p1243_p9, %p1240_p8 }
  0x1a   :  { %1248 = shalt.err (!%p1245_p10)
}
  0x1b   :  { %s1249_s12 = scalar_lea.vmem %s1367_s18, 256  ;;  %p1254_p12 = scmp.lt.s32.totalorder %s1367_s18, %s1367_s18 }
  0x1c   :  { %p1250_p11 = scmp.ne.s32.totalorder %s1367_s18, %s1249_s12  ;;  %p1255_p13 = scmp.lt.s32.totalorder %s1249_s12, %s1249_s12 }
  0x1e   :  { %p1256_p0 = por %p1255_p13, %p1254_p12 }
  0x20   :  { %p1257_p1 = pnand %p1256_p0, %p1250_p11 }
  0x22   :  { %1260 = shalt.err (!%p1257_p1)
}
  0x23   :  { %25 = dma.hbm_to_vmem [thread:$0]  %s3162_s0, 256, %s1367_s18, [#allocation3], %s1337_s27, %s1337_s27, %s1338_s28  }
  0x24   :  { %s1339_s14 = smov [#allocation7]   ;;  %s1261_s19 = scalar_lea.hbm %s3164_s2, 160 }
  0x25   :  { %s43_s15 = sshll.u32 %s1339_s14, 4  ;;  %p1262_p2 = scmp.ne.s32.totalorder %s3164_s2, %s1261_s19  ;;  %s44_s15 = int_to_ptr.vmem [resolvable:$true] %s43_s15 }
  0x26   :  { %p1265_p3 = scmp.lt.u32.totalorder %s1261_s19, %s3164_s2 }
  0x28   :  { %p1267_p4 = pnand %p1265_p3, %p1262_p2 }
  0x2a   :  { %1270 = shalt.err (!%p1267_p4)
}
  0x2b   :  { %s1271_s24 = scalar_lea.vmem %s44_s15, 160  ;;  %p1276_p6 = scmp.lt.s32.totalorder %s44_s15, %s44_s15 }
  0x2c   :  { %p1272_p5 = scmp.ne.s32.totalorder %s44_s15, %s1271_s24  ;;  %p1277_p7 = scmp.lt.s32.totalorder %s1271_s24, %s1271_s24 }
  0x2e   :  { %p1278_p8 = por %p1277_p7, %p1276_p6 }
  0x30   :  { %p1279_p9 = pnand %p1278_p8, %p1272_p5 }
  0x32   :  { %1282 = shalt.err (!%p1279_p9)
}
  0x33   :  { %49 = dma.hbm_to_vmem [thread:$0]  %s3164_s2, 160, %s44_s15, [#allocation6], %s1337_s27, %s1337_s27, %s1338_s28  }
  0x34   :  { %1327 = dma.done.wait [#allocation3], 256  }
  0x35   :  { %1328 = vsyncadd [#allocation3], 4294967040 }
  0x36   :  { %1329 = dma.done.wait [#allocation6], 224  }
  0x37   :  { %1330 = vsyncadd [#allocation6], 4294967072  ;;  %v1419_v0 = vld [vmem:[#allocation2] sm:$0x1]  ;;  %v1421_v1 = vld [vmem:[#allocation2 + $0x1] sm:$0x1] }
  0x38   :  { %3233 = vst [vmem:[#allocation15_spill] sm:$0xff] %v1419_v0  ;;  %3234 = vst [vmem:[#allocation16_spill] sm:$0xff] %v1421_v1  ;;  %v1423_v2 = vld [vmem:[#allocation2 + $0x2] sm:$0x1]  ;;  %v1425_v3 = vld [vmem:[#allocation2 + $0x3] sm:$0x1]  ;;  %v1433_v6 = vmul.f32 %v1419_v0, %v1419_v0  ;;  %v1437_v7 = vmul.f32 %v1421_v1, %v1421_v1 }
  0x39   :  { %3235 = vst [vmem:[#allocation17_spill] sm:$0xff] %v1423_v2  ;;  %3236 = vst [vmem:[#allocation18_spill] sm:$0xff] %v1425_v3  ;;  %v1427_v4 = vld [vmem:[#allocation5] sm:$0x1]  ;;  %v1429_v5 = vld [vmem:[#allocation5 + $0x1] sm:$0x1]  ;;  %v1441_v8 = vmul.f32 %v1423_v2, %v1423_v2  ;;  %v1450_v12 = vmul.f32 %v1425_v3, %v1425_v3 }
  0x3a   :  { %v1443_v9 = vld [vmem:[#allocation5 + $0x2] sm:$0x1]  ;;  %v1445_v10 = vld [vmem:[#allocation5 + $0x3] sm:$0x1]  ;;  %v79_v11 = vmul.f32 1.442695, %v1427_v4  ;;  %v1454_v13 = vsub.f32 %v1427_v4, %v1429_v5  ;;  %v1458_v14 = vsub.f32 %v1429_v5, %v1427_v4 }
  0x3b   :  { %v81_v15 = vmul.f32 1.442695, %v1429_v5  ;;  %v83_v16 = vmul.f32 1.442695, %v1443_v9  ;;  %v85_v17 = vmul.f32 1.442695, %v1445_v10  ;;  %v1465_v18 = vsub.f32 %v1427_v4, %v1443_v9 }
  0x3c   :  { %1169 = vpow2.f32 %v79_v11  ;;  %v1467_v19 = vld [vmem:[#allocation2 + $0x4] sm:$0x1]  ;;  %v1469_v20 = vld [vmem:[#allocation2 + $0x5] sm:$0x1]  ;;  %v1471_v21 = vld [vmem:[#allocation2 + $0x6] sm:$0x1]  ;;  %v1475_v22 = vsub.f32 %v1427_v4, %v1445_v10  ;;  %v1479_v23 = vsub.f32 %v1429_v5, %v1443_v9  ;;  %v1483_v24 = vsub.f32 %v1429_v5, %v1445_v10 }
  0x3d   :  { %3237 = vst [vmem:[#allocation19_spill] sm:$0xff] %v1467_v19  ;;  %3238 = vst [vmem:[#allocation20_spill] sm:$0xff] %v1469_v20  ;;  %1171 = vpow2.f32 %v81_v15  ;;  %v1485_v25 = vld [vmem:[#allocation2 + $0x7] sm:$0x1]  ;;  %v91_v26 = vmul.f32 %v1467_v19, %v1419_v0  ;;  %v92_v27 = vmul.f32 %v1469_v20, %v1421_v1  ;;  %v93_v28 = vmul.f32 %v1471_v21, %v1423_v2  ;;  %v1493_v29 = vld [vmem:[#allocation2 + $0x8] sm:$0x1] }
  0x3e   :  { %3239 = vst [vmem:[#allocation21_spill] sm:$0xff] %v1471_v21  ;;  %3240 = vst [vmem:[#allocation22_spill] sm:$0xff] %v1479_v23  ;;  %v1495_v30 = vld [vmem:[#allocation2 + $0x9] sm:$0x1]  ;;  %1173 = vpow2.f32 %v83_v16  ;;  %v94_v31 = vmul.f32 %v1485_v25, %v1425_v3  ;;  %v1499_v32 = vld [vmem:[#allocation2 + $0xa] sm:$0x1]  ;;  %v95_v34 = vmul.f32 %v1493_v29, %v1419_v0  ;;  %v1531_v46 = vmul.f32 %v1467_v19, %v1467_v19 }
  0x3f   :  { %3241 = vst [vmem:[#allocation23_spill] sm:$0xff] %v1483_v24  ;;  %3242 = vst [vmem:[#allocation24_spill] sm:$0xff] %v1485_v25  ;;  %v1501_v33 = vld [vmem:[#allocation2 + $0xb] sm:$0x1]  ;;  %v96_v35 = vmul.f32 %v1495_v30, %v1421_v1  ;;  %v1507_v36 = vld [vmem:[#allocation2 + $0xc] sm:$0x1]  ;;  %1175 = vpow2.f32 %v85_v17  ;;  %v97_v37 = vmul.f32 %v1499_v32, %v1423_v2  ;;  %v1535_v47 = vmul.f32 %v1469_v20, %v1469_v20 }
  0x40   :  { %3243 = vst [vmem:[#allocation25_spill] sm:$0xff] %v1493_v29  ;;  %3244 = vst [vmem:[#allocation26_spill] sm:$0xff] %v1495_v30  ;;  %v98_v38 = vmul.f32 %v1501_v33, %v1425_v3  ;;  %v1513_v39 = vld [vmem:[#allocation2 + $0xd] sm:$0x1]  ;;  %v1515_v40 = vld [vmem:[#allocation2 + $0xe] sm:$0x1]  ;;  %v99_v42 = vmul.f32 %v1507_v36, %v1419_v0  ;;  %v1539_v48 = vmul.f32 %v1471_v21, %v1471_v21 }
  0x41   :  { %3245 = vst [vmem:[#allocation27_spill] sm:$0xff] %v1499_v32  ;;  %3246 = vst [vmem:[#allocation28_spill] sm:$0xff] %v1501_v33  ;;  %v1517_v41 = vld [vmem:[#allocation2 + $0xf] sm:$0x1]  ;;  %vm167_vm0 = vcmask 1040384   ;;  %v100_v43 = vmul.f32 %v1513_v39, %v1421_v1  ;;  %v101_v44 = vmul.f32 %v1515_v40, %v1423_v2  ;;  %v1543_v49 = vmul.f32 %v1485_v25, %v1485_v25  ;;  %s1340_s2 = smov [#allocation8]  }
  0x42   :  { %3247 = vst [vmem:[#allocation29_spill] sm:$0xff] %v1507_v36  ;;  %3248 = vst [vmem:[#allocation30_spill] sm:$0xff] %v1513_v39  ;;  %v1527_v45 = vmul.f32 %v1517_v41, %v1425_v3  ;;  %v1547_v50 = vmul.f32 %v1493_v29, %v1467_v19  ;;  %v1551_v51 = vmul.f32 %v1495_v30, %v1469_v20  ;;  %vm287_vm1 = vcmp.ne.f32.partialorder %v1454_v13, 0.0  ;;  %s1133_s25 = sshll.u32 %s1340_s2, 4  ;;  %s1134_s25 = int_to_ptr.vmem [resolvable:$true] %s1133_s25 }
  0x43   :  { %3249 = vst [vmem:[#allocation31_spill] sm:$0xff] %v1515_v40  ;;  %3250 = vst [vmem:[#allocation32_spill] sm:$0xff] %v1517_v41  ;;  %v1555_v52 = vmul.f32 %v1499_v32, %v1471_v21  ;;  %v1559_v53 = vmul.f32 %v1501_v33, %v1485_v25  ;;  %v1563_v54 = vmul.f32 %v1507_v36, %v1467_v19  ;;  %vm288_vm2 = vcmp.ne.f32.partialorder %v1465_v18, 0.0  ;;  %s1283_s26 = scalar_lea.vmem %s1134_s25, 256  ;;  %p1288_p11 = scmp.lt.s32.totalorder %s1134_s25, %s1134_s25 }
  0x44   :  { %v1567_v55 = vmul.f32 %v1513_v39, %v1469_v20  ;;  %v1571_v56 = vmul.f32 %v1515_v40, %v1471_v21  ;;  %v1575_v57 = vmul.f32 %v1517_v41, %v1485_v25  ;;  %v1579_v58 = vmul.f32 %v1493_v29, %v1493_v29  ;;  %p1284_p10 = scmp.ne.s32.totalorder %s1134_s25, %s1283_s26  ;;  %p1289_p12 = scmp.lt.s32.totalorder %s1283_s26, %s1283_s26 }
  0x45   :  { %v1583_v59 = vmul.f32 %v1495_v30, %v1495_v30  ;;  %v1587_v60 = vmul.f32 %v1499_v32, %v1499_v32  ;;  %v1591_v61 = vmul.f32 %v1501_v33, %v1501_v33  ;;  %v1595_v62 = vmul.f32 %v1507_v36, %v1493_v29 }
  0x46   :  { %v1599_v63 = vmul.f32 %v1513_v39, %v1495_v30  ;;  %v1603_v11 = vmul.f32 %v1515_v40, %v1499_v32  ;;  %v1607_v15 = vmul.f32 %v1517_v41, %v1501_v33  ;;  %v1611_v16 = vmul.f32 %v1507_v36, %v1507_v36  ;;  %v1613_v17 = vpop.eup %1169  ;;  %p1290_p13 = por %p1289_p12, %p1288_p11 }
  0x47   :  { %3251 = vst [vmem:[#allocation33_spill] sm:$0xff] %v1613_v17  ;;  %v1617_v29 = vmul.f32 %v1513_v39, %v1513_v39  ;;  %v1621_v30 = vmul.f32 %v1515_v40, %v1515_v40  ;;  %v1625_v32 = vmul.f32 %v1517_v41, %v1517_v41  ;;  %v1629_v33 = vsub.f32 %v1443_v9, %v1427_v4  ;;  %v1631_v36 = vpop.eup %1171 }
  0x48   :  { %3253 = vst [vmem:[#allocation35_spill] sm:$0xff] %v1631_v36  ;;  %v127_v25 = vmul.f32 %v1613_v17, %v1433_v6  ;;  %v131_v39 = vmul.f32 %v1613_v17, %v91_v26  ;;  %v135_v21 = vmul.f32 %v1613_v17, %v95_v34  ;;  %v139_v40 = vmul.f32 %v1613_v17, %v99_v42  ;;  %v1638_v20 = vpop.eup %1173  ;;  %p1291_p0 = pnand %p1290_p13, %p1284_p10 }
  0x49   :  { %3252 = vst [vmem:[#allocation34_spill] sm:$0xff] %v1629_v33  ;;  %3254 = vst [vmem:[#allocation36_spill] sm:$0xff] %v1638_v20  ;;  %v128_v41 = vmul.f32 %v1631_v36, %v1437_v7  ;;  %v132_v19 = vmul.f32 %v1631_v36, %v92_v27  ;;  %v136_v3 = vmul.f32 %v1631_v36, %v96_v35  ;;  %v1645_v1 = vpop.eup %1175  ;;  %vm289_vm3 = vcmp.ne.f32.partialorder %v1475_v22, 0.0 }
  0x4a   :  { %v140_v2 = vmul.f32 %v1631_v36, %v100_v43  ;;  %3255 = vst [vmem:[#allocation37_spill] sm:$0xff] %v1645_v1  ;;  %v129_v6 = vmul.f32 %v1638_v20, %v1441_v8  ;;  %v168_v26 = vsel %vm167_vm0, %v127_v25, 0.0  ;;  %v133_v34 = vmul.f32 %v1638_v20, %v93_v28 }
  0x4b   :  { %v175_v42 = vsel %vm167_vm0, %v131_v39, 0.0  ;;  %v130_v7 = vmul.f32 %v1645_v1, %v1450_v12  ;;  %v169_v27 = vsel %vm167_vm0, %v128_v41, 0.0  ;;  %v134_v35 = vmul.f32 %v1645_v1, %v94_v31 }
  0x4c   :  { %v176_v43 = vsel %vm167_vm0, %v132_v19, 0.0  ;;  %v170_v0 = vadd.f32 %v169_v27, %v168_v26  ;;  %v171_v33 = vsel %vm167_vm0, %v129_v6, 0.0  ;;  %v178_v8 = vsel %vm167_vm0, %v133_v34, 0.0 }
  0x4d   :  { %v177_v24 = vadd.f32 %v176_v43, %v175_v42  ;;  %v173_v25 = vsel %vm167_vm0, %v130_v7, 0.0  ;;  %v180_v28 = vsel %vm167_vm0, %v134_v35, 0.0  ;;  %v137_v39 = vmul.f32 %v1638_v20, %v97_v37 }
  0x4e   :  { %v138_v12 = vmul.f32 %v1645_v1, %v98_v38  ;;  %v172_v23 = vadd.f32 %v171_v33, %v170_v0  ;;  %v182_v31 = vsel %vm167_vm0, %v135_v21, 0.0  ;;  %v183_v19 = vsel %vm167_vm0, %v136_v3, 0.0 }
  0x4f   :  { %v179_v41 = vadd.f32 %v178_v8, %v177_v24  ;;  %v184_v26 = vadd.f32 %v183_v19, %v182_v31  ;;  %v185_v6 = vsel %vm167_vm0, %v137_v39, 0.0  ;;  %v141_v34 = vmul.f32 %v1638_v20, %v101_v44 }
  0x50   :  { %v187_v42 = vsel %vm167_vm0, %v138_v12, 0.0  ;;  %v174_v7 = vadd.f32 %v173_v25, %v172_v23  ;;  %v142_v37 = vmul.f32 %v1645_v1, %v1527_v45  ;;  %v189_v38 = vsel %vm167_vm0, %v139_v40, 0.0 }
  0x51   :  { %v181_v27 = vadd.f32 %v180_v28, %v179_v41  ;;  %v186_v0 = vadd.f32 %v185_v6, %v184_v26  ;;  %v190_v24 = vsel %vm167_vm0, %v140_v2, 0.0  ;;  %v192_v21 = vsel %vm167_vm0, %v141_v34, 0.0 }
  0x52   :  { %v143_v3 = vmul.f32 %v1613_v17, %v1531_v46  ;;  %238 = vst [vmem:[#allocation8] sm:$0x1] %v174_v7  ;;  %v191_v33 = vadd.f32 %v190_v24, %v189_v38  ;;  %v194_v23 = vsel %vm167_vm0, %v142_v37, 0.0  ;;  %v144_v44 = vmul.f32 %v1631_v36, %v1535_v47 }
  0x53   :  { %239 = vst [vmem:[#allocation8 + $0x1] sm:$0x1] %v181_v27  ;;  %242 = vst [vmem:[#allocation8 + $0x4] sm:$0x1] %v181_v27  ;;  %v145_v40 = vmul.f32 %v1638_v20, %v1539_v48  ;;  %v188_v45 = vadd.f32 %v187_v42, %v186_v0  ;;  %v146_v2 = vmul.f32 %v1645_v1, %v1543_v49  ;;  %vm290_vm4 = vcmp.ne.f32.partialorder %v1458_v14, 0.0 }
  0x54   :  { %v196_v35 = vsel %vm167_vm0, %v143_v3, 0.0  ;;  %v147_v46 = vmul.f32 %v1613_v17, %v1547_v50  ;;  %v193_v43 = vadd.f32 %v192_v21, %v191_v33  ;;  %v197_v8 = vsel %vm167_vm0, %v144_v44, 0.0 }
  0x55   :  { %v199_v25 = vsel %vm167_vm0, %v145_v40, 0.0  ;;  %v148_v47 = vmul.f32 %v1631_v36, %v1551_v51  ;;  %240 = vst [vmem:[#allocation8 + $0x2] sm:$0x1] %v188_v45  ;;  %246 = vst [vmem:[#allocation8 + $0x8] sm:$0x1] %v188_v45  ;;  %v198_v48 = vadd.f32 %v197_v8, %v196_v35  ;;  %v201_v28 = vsel %vm167_vm0, %v146_v2, 0.0 }
  0x56   :  { %v149_v49 = vmul.f32 %v1638_v20, %v1555_v52  ;;  %v150_v39 = vmul.f32 %v1645_v1, %v1559_v53  ;;  %v195_v50 = vadd.f32 %v194_v23, %v193_v43  ;;  %v203_v12 = vsel %vm167_vm0, %v147_v46, 0.0 }
  0x57   :  { %v204_v41 = vsel %vm167_vm0, %v148_v47, 0.0  ;;  %v151_v31 = vmul.f32 %v1613_v17, %v1563_v54  ;;  %v200_v51 = vadd.f32 %v199_v25, %v198_v48  ;;  %v152_v52 = vmul.f32 %v1631_v36, %v1567_v55 }
  0x58   :  { %v205_v19 = vadd.f32 %v204_v41, %v203_v12  ;;  %v206_v26 = vsel %vm167_vm0, %v149_v49, 0.0  ;;  %v208_v6 = vsel %vm167_vm0, %v150_v39, 0.0  ;;  %241 = vst [vmem:[#allocation8 + $0x3] sm:$0x1] %v195_v50  ;;  %250 = vst [vmem:[#allocation8 + $0xc] sm:$0x1] %v195_v50  ;;  %v153_v53 = vmul.f32 %v1638_v20, %v1571_v56 }
  0x59   :  { %v154_v42 = vmul.f32 %v1645_v1, %v1575_v57  ;;  %v210_v34 = vsel %vm167_vm0, %v151_v31, 0.0  ;;  %v202_v54 = vadd.f32 %v201_v28, %v200_v51  ;;  %v155_v27 = vmul.f32 %v1613_v17, %v1579_v58 }
  0x5a   :  { %v207_v7 = vadd.f32 %v206_v26, %v205_v19  ;;  %v156_v37 = vmul.f32 %v1631_v36, %v1583_v59  ;;  %v211_v38 = vsel %vm167_vm0, %v152_v52, 0.0  ;;  %v213_v55 = vsel %vm167_vm0, %v153_v53, 0.0  ;;  %v384_v53 = vld [vmem:[#allocation7 + $0x2] sm:$0x1] }
  0x5b   :  { %v215_v0 = vsel %vm167_vm0, %v154_v42, 0.0  ;;  %v157_v56 = vmul.f32 %v1638_v20, %v1587_v60  ;;  %243 = vst [vmem:[#allocation8 + $0x5] sm:$0x1] %v202_v54  ;;  %v212_v24 = vadd.f32 %v211_v38, %v210_v34  ;;  %v158_v21 = vmul.f32 %v1645_v1, %v1591_v61  ;;  %v3257_v38 = vld [vmem:[#allocation23_spill] sm:$0xff] }
  0x5c   :  { %v209_v57 = vadd.f32 %v208_v6, %v207_v7  ;;  %v217_v58 = vsel %vm167_vm0, %v155_v27, 0.0  ;;  %v218_v3 = vsel %vm167_vm0, %v156_v37, 0.0  ;;  %v159_v33 = vmul.f32 %v1613_v17, %v1595_v62  ;;  %v3256_v37 = vld [vmem:[#allocation22_spill] sm:$0xff] }
  0x5d   :  { %v220_v59 = vsel %vm167_vm0, %v157_v56, 0.0  ;;  %v160_v23 = vmul.f32 %v1631_v36, %v1599_v63  ;;  %v214_v60 = vadd.f32 %v213_v55, %v212_v24  ;;  %v219_v44 = vadd.f32 %v218_v3, %v217_v58  ;;  %v3258_v55 = vld [vmem:[#allocation34_spill] sm:$0xff] }
  0x5e   :  { %244 = vst [vmem:[#allocation8 + $0x6] sm:$0x1] %v209_v57  ;;  %247 = vst [vmem:[#allocation8 + $0x9] sm:$0x1] %v209_v57  ;;  %v222_v40 = vsel %vm167_vm0, %v158_v21, 0.0  ;;  %v161_v61 = vmul.f32 %v1638_v20, %v1603_v11  ;;  %v162_v45 = vmul.f32 %v1645_v1, %v1607_v15  ;;  %v224_v2 = vsel %vm167_vm0, %v159_v33, 0.0 }
  0x5f   :  { %v225_v35 = vsel %vm167_vm0, %v160_v23, 0.0  ;;  %v163_v62 = vmul.f32 %v1613_v17, %v1611_v16  ;;  %v216_v63 = vadd.f32 %v215_v0, %v214_v60  ;;  %v221_v46 = vadd.f32 %v220_v59, %v219_v44  ;;  %v382_v0 = vld [vmem:[#allocation7] sm:$0x1]  ;;  %v386_v57 = vld [vmem:[#allocation7 + $0x4] sm:$0x1] }
  0x60   :  { %v226_v43 = vadd.f32 %v225_v35, %v224_v2  ;;  %v227_v8 = vsel %vm167_vm0, %v161_v61, 0.0  ;;  %v229_v25 = vsel %vm167_vm0, %v162_v45, 0.0  ;;  %v164_v11 = vmul.f32 %v1631_v36, %v1617_v29  ;;  %v1817_v59 = vld [vmem:[#allocation7 + $0x5] sm:$0x1]  ;;  %v3259_v35 = vld [vmem:[#allocation15_spill] sm:$0xff] }
  0x61   :  { %v165_v15 = vmul.f32 %v1638_v20, %v1621_v30  ;;  %v166_v47 = vmul.f32 %v1645_v1, %v1625_v32  ;;  %245 = vst [vmem:[#allocation8 + $0x7] sm:$0x1] %v216_v63  ;;  %251 = vst [vmem:[#allocation8 + $0xd] sm:$0x1] %v216_v63  ;;  %v223_v48 = vadd.f32 %v222_v40, %v221_v46  ;;  %v231_v28 = vsel %vm167_vm0, %v163_v62, 0.0 }
  0x62   :  { %v228_v16 = vadd.f32 %v227_v8, %v226_v43  ;;  %v1745_v49 = vsub.f32 %v1443_v9, %v1429_v5  ;;  %v232_v39 = vsel %vm167_vm0, %v164_v11, 0.0  ;;  %v1752_v30 = vsub.f32 %v1443_v9, %v1445_v10  ;;  %v1831_v40 = vld [vmem:[#allocation7 + $0x7] sm:$0x1]  ;;  %v3260_v8 = vld [vmem:[#allocation16_spill] sm:$0xff]  ;;  %v1940_v6 = vld [vmem:[#allocation7 + $0x9] sm:$0x1] }
  0x63   :  { %v234_v29 = vsel %vm167_vm0, %v165_v15, 0.0  ;;  %v236_v50 = vsel %vm167_vm0, %v166_v47, 0.0  ;;  %248 = vst [vmem:[#allocation8 + $0xa] sm:$0x1] %v223_v48  ;;  %v233_v12 = vadd.f32 %v232_v39, %v231_v28  ;;  %v1756_v41 = vsub.f32 %v1445_v10, %v1427_v4  ;;  %v383_v15 = vld [vmem:[#allocation7 + $0x1] sm:$0x1] }
  0x64   :  { %v230_v32 = vadd.f32 %v229_v25, %v228_v16  ;;  %v1760_v31 = vsub.f32 %v1445_v10, %v1429_v5  ;;  %v1764_v51 = vsub.f32 %v1445_v10, %v1443_v9  ;;  %vm292_vm5 = vcmp.ne.f32.partialorder %v3256_v37, 0.0  ;;  %v3261_v16 = vld [vmem:[#allocation17_spill] sm:$0xff]  ;;  %v1873_v39 = vld [vmem:[#allocation7 + $0x6] sm:$0x1] }
  0x65   :  { %v235_v4 = vadd.f32 %v234_v29, %v233_v12  ;;  %vm293_vm6 = vcmp.ne.f32.partialorder %v3257_v38, 0.0  ;;  %vm294_vm7 = vcmp.ne.f32.partialorder %v3258_v55, 0.0  ;;  %vm295_vm8 = vcmp.ne.f32.partialorder %v1745_v49, 0.0  ;;  %v1875_v29 = vld [vmem:[#allocation7 + $0x8] sm:$0x1]  ;;  %v3270_v10 = vld [vmem:[#allocation21_spill] sm:$0xff] }
  0x66   :  { %249 = vst [vmem:[#allocation8 + $0xb] sm:$0x1] %v230_v32  ;;  %252 = vst [vmem:[#allocation8 + $0xe] sm:$0x1] %v230_v32  ;;  %vm297_vm9 = vcmp.ne.f32.partialorder %v1752_v30, 0.0  ;;  %vm298_vm10 = vcmp.ne.f32.partialorder %v1756_v41, 0.0  ;;  %v1843_v62 = vmul.f32 %v382_v0, %v3259_v35  ;;  %v1846_v63 = vmul.f32 %v386_v57, %v3259_v35 }
  0x67   :  { %v237_v54 = vadd.f32 %v236_v50, %v235_v4  ;;  %vm299_vm11 = vcmp.ne.f32.partialorder %v1760_v31, 0.0  ;;  %vm300_vm12 = vcmp.ne.f32.partialorder %v1764_v51, 0.0  ;;  %v303_v56 = vsel %vm287_vm1, %v1454_v13, 1.0  ;;  %v3263_v4 = vld [vmem:[#allocation18_spill] sm:$0xff] }
  0x68   :  { %v304_v24 = vsel %vm288_vm2, %v1465_v18, 1.0  ;;  %v305_v21 = vsel %vm289_vm3, %v1475_v22, 1.0  ;;  %v306_v58 = vsel %vm290_vm4, %v1458_v14, 1.0  ;;  %v308_v3 = vsel %vm292_vm5, %v3256_v37, 1.0  ;;  %v385_v37 = vld [vmem:[#allocation7 + $0x3] sm:$0x1] }
  0x69   :  { %253 = vst [vmem:[#allocation8 + $0xf] sm:$0x1] %v237_v54  ;;  %v309_v33 = vsel %vm293_vm6, %v3257_v38, 1.0  ;;  %v310_v23 = vsel %vm294_vm7, %v3258_v55, 1.0  ;;  %v311_v60 = vsel %vm295_vm8, %v1745_v49, 1.0  ;;  %v313_v44 = vsel %vm297_vm9, %v1752_v30, 1.0 }
  0x6a   :  { %v314_v61 = vsel %vm298_vm10, %v1756_v41, 1.0  ;;  %v315_v45 = vsel %vm299_vm11, %v1760_v31, 1.0  ;;  %v316_v2 = vsel %vm300_vm12, %v1764_v51, 1.0  ;;  %1177 = vrcp.f32 %v303_v56  ;;  %v3299_v38 = vld [vmem:[#allocation29_spill] sm:$0xff]  ;;  %v3304_v49 = vld [vmem:[#allocation30_spill] sm:$0xff] }
  0x6b   :  { %1179 = vrcp.f32 %v304_v24  ;;  %v1850_v46 = vmul.f32 %v1817_v59, %v3259_v35  ;;  %v1854_v43 = vmul.f32 %v1831_v40, %v3259_v35  ;;  %v1857_v25 = vmul.f32 %v382_v0, %v3260_v8  ;;  %v3279_v35 = vld [vmem:[#allocation25_spill] sm:$0xff] }
  0x6c   :  { %1181 = vrcp.f32 %v305_v21  ;;  %v1860_v11 = vmul.f32 %v386_v57, %v3260_v8  ;;  %v1864_v47 = vmul.f32 %v1817_v59, %v3260_v8  ;;  %v1868_v48 = vmul.f32 %v1831_v40, %v3260_v8 }
  0x6d   :  { %1183 = vrcp.f32 %v306_v58  ;;  %v1871_v28 = vmul.f32 %v382_v0, %v3261_v16  ;;  %v1878_v50 = vmul.f32 %v386_v57, %v3261_v16  ;;  %v1882_v32 = vmul.f32 %v1817_v59, %v3261_v16  ;;  %v3268_v58 = vld [vmem:[#allocation19_spill] sm:$0xff] }
  0x6e   :  { %1185 = vrcp.f32 %v308_v3  ;;  %v1886_v12 = vmul.f32 %v1831_v40, %v3261_v16  ;;  %v1889_v54 = vmul.f32 %v382_v0, %v3263_v4  ;;  %v1892_v56 = vmul.f32 %v386_v57, %v3263_v4 }
  0x6f   :  { %1187 = vrcp.f32 %v309_v33  ;;  %v1896_v24 = vmul.f32 %v1817_v59, %v3263_v4  ;;  %v1900_v21 = vmul.f32 %v1831_v40, %v3263_v4  ;;  %v1903_v3 = vmul.f32 %v386_v57, %v3268_v58 }
  0x70   :  { %3262 = vst [vmem:[#allocation22_spill] sm:$0xff] %v1886_v12  ;;  %3264 = vst [vmem:[#allocation23_spill] sm:$0xff] %v1889_v54  ;;  %1189 = vrcp.f32 %v310_v23  ;;  %v1906_v33 = vmul.f32 %v383_v15, %v3268_v58  ;;  %v1910_v0 = vmul.f32 %v1873_v39, %v3268_v58  ;;  %v1914_v27 = vmul.f32 %v1875_v29, %v3268_v58  ;;  %v3269_v23 = vld [vmem:[#allocation20_spill] sm:$0xff] }
  0x71   :  { %3265 = vst [vmem:[#allocation34_spill] sm:$0xff] %v1892_v56  ;;  %3266 = vst [vmem:[#allocation38_spill] sm:$0xff] %v1896_v24  ;;  %1191 = vrcp.f32 %v311_v60  ;;  %v1917_v7 = vmul.f32 %v386_v57, %v3269_v23  ;;  %v1920_v34 = vmul.f32 %v383_v15, %v3269_v23  ;;  %v1924_v42 = vmul.f32 %v1873_v39, %v3269_v23 }
  0x72   :  { %3267 = vst [vmem:[#allocation39_spill] sm:$0xff] %v1900_v21  ;;  %1193 = vrcp.f32 %v313_v44  ;;  %v1928_v60 = vmul.f32 %v1875_v29, %v3269_v23  ;;  %v1931_v9 = vmul.f32 %v386_v57, %v3270_v10  ;;  %v1934_v52 = vmul.f32 %v383_v15, %v3270_v10 }
  0x73   :  { %1195 = vrcp.f32 %v314_v61  ;;  %v1938_v44 = vmul.f32 %v1873_v39, %v3270_v10  ;;  %v1944_v26 = vmul.f32 %v1875_v29, %v3270_v10  ;;  %v3272_v61 = vld [vmem:[#allocation24_spill] sm:$0xff]  ;;  %v3275_v4 = vsub.f32 %v1613_v17, %v1631_v36 }
  0x74   :  { %v1178_v5 = vpop.eup %1177  ;;  %1197 = vrcp.f32 %v315_v45  ;;  %v1947_v19 = vmul.f32 %v386_v57, %v3272_v61  ;;  %v1950_v23 = vmul.f32 %v383_v15, %v3272_v61  ;;  %v1957_v45 = vmul.f32 %v1873_v39, %v3272_v61 }
  0x75   :  { %3271 = vst [vmem:[#allocation40_spill] sm:$0xff] %v1944_v26  ;;  %v1180_v58 = vpop.eup %1179  ;;  %v321_v16 = vmul.f32 %v1178_v5, %v3275_v4  ;;  %1199 = vrcp.f32 %v316_v2  ;;  %v1961_v10 = vmul.f32 %v1875_v29, %v3272_v61  ;;  %v3278_v57 = vsub.f32 %v1613_v17, %v1638_v20 }
  0x76   :  { %3273 = vst [vmem:[#allocation41_spill] sm:$0xff] %v1947_v19  ;;  %3274 = vst [vmem:[#allocation42_spill] sm:$0xff] %v1950_v23  ;;  %v1182_v8 = vpop.eup %1181  ;;  %v1968_v21 = vmul.f32 %v1817_v59, %v3279_v35  ;;  %v1972_v5 = vmul.f32 %v1873_v39, %v3279_v35  ;;  %v1975_v2 = vmul.f32 %v384_v53, %v3279_v35 }
  0x77   :  { %3276 = vst [vmem:[#allocation43_spill] sm:$0xff] %v1957_v45  ;;  %3277 = vst [vmem:[#allocation44_spill] sm:$0xff] %v1961_v10  ;;  %v323_v15 = vmul.f32 %v1180_v58, %v3278_v57  ;;  %v1184_v4 = vpop.eup %1183  ;;  %v3280_v61 = vsub.f32 %v1613_v17, %v1645_v1  ;;  %v1982_v45 = vsel %vm287_vm1, %v321_v16, 0.0  ;;  %v1986_v58 = vmul.f32 %v1940_v6, %v3279_v35  ;;  %v3282_v57 = vld [vmem:[#allocation26_spill] sm:$0xff] }
  0x78   :  { %3281 = vst [vmem:[#allocation45_spill] sm:$0xff] %v1982_v45  ;;  %v1990_v24 = vmul.f32 %v1817_v59, %v3282_v57  ;;  %v1186_v23 = vpop.eup %1185  ;;  %v3283_v56 = vsub.f32 %v1631_v36, %v1613_v17  ;;  %v2001_v13 = vmul.f32 %v1873_v39, %v3282_v57  ;;  %v2004_v16 = vmul.f32 %v384_v53, %v3282_v57 }
  0x79   :  { %v325_v10 = vmul.f32 %v1182_v8, %v3280_v61  ;;  %v1997_v8 = vsel %vm288_vm2, %v323_v15, 0.0  ;;  %v1188_v61 = vpop.eup %1187  ;;  %v3285_v45 = vsub.f32 %v1631_v36, %v1638_v20  ;;  %v2015_v18 = vmul.f32 %v1940_v6, %v3282_v57 }
  0x7a   :  { %v327_v19 = vmul.f32 %v1184_v4, %v3283_v56  ;;  %3284 = vst [vmem:[#allocation46_spill] sm:$0xff] %v1997_v8  ;;  %v3287_v56 = vld [vmem:[#allocation27_spill] sm:$0xff]  ;;  %v1190_v4 = vpop.eup %1189  ;;  %v3288_v8 = vsub.f32 %v1631_v36, %v1645_v1  ;;  %v441_v55 = vmul.f32 %v1875_v29, %v3299_v38  ;;  %v446_v30 = vmul.f32 %v1940_v6, %v3304_v49 }
  0x7b   :  { %v331_v35 = vmul.f32 %v1186_v23, %v3285_v45  ;;  %v2011_v54 = vsel %vm289_vm3, %v325_v10, 0.0  ;;  %v2019_v15 = vmul.f32 %v1817_v59, %v3287_v56  ;;  %v2030_v22 = vmul.f32 %v1873_v39, %v3287_v56  ;;  %v1192_v45 = vpop.eup %1191 }
  0x7c   :  { %3286 = vst [vmem:[#allocation47_spill] sm:$0xff] %v2011_v54  ;;  %v333_v26 = vmul.f32 %v1188_v61, %v3288_v8  ;;  %v2026_v23 = vsel %vm290_vm4, %v327_v19, 0.0  ;;  %v2033_v10 = vmul.f32 %v384_v53, %v3287_v56  ;;  %v3291_v54 = vsub.f32 %v1638_v20, %v1613_v17  ;;  %v3293_v19 = vld [vmem:[#allocation28_spill] sm:$0xff]  ;;  %v1194_v61 = vpop.eup %1193 }
  0x7d   :  { %3289 = vst [vmem:[#allocation48_spill] sm:$0xff] %v2026_v23  ;;  %v2040_v12 = vsel %vm292_vm5, %v331_v35, 0.0  ;;  %v2044_v14 = vmul.f32 %v1940_v6, %v3287_v56  ;;  %v2048_v8 = vmul.f32 %v1817_v59, %v3293_v19  ;;  %v3294_v23 = vsub.f32 %v1638_v20, %v1631_v36 }
  0x7e   :  { %3290 = vst [vmem:[#allocation49_spill] sm:$0xff] %v2033_v10  ;;  %v335_v57 = vmul.f32 %v1190_v4, %v3291_v54  ;;  %3292 = vst [vmem:[#allocation50_spill] sm:$0xff] %v2040_v12  ;;  %v2055_v54 = vsel %vm293_vm6, %v333_v26, 0.0  ;;  %v2059_v35 = vmul.f32 %v1873_v39, %v3293_v19  ;;  %v2062_v4 = vmul.f32 %v384_v53, %v3293_v19  ;;  %v1196_v12 = vpop.eup %1195 }
  0x7f   :  { %v337_v10 = vmul.f32 %v1192_v45, %v3294_v23  ;;  %3295 = vst [vmem:[#allocation51_spill] sm:$0xff] %v2055_v54  ;;  %v3297_v59 = vsub.f32 %v1638_v20, %v1645_v1  ;;  %v2073_v26 = vmul.f32 %v1940_v6, %v3293_v19  ;;  %v440_v39 = vmul.f32 %v1831_v40, %v3299_v38  ;;  %v1198_v45 = vpop.eup %1197 }
  0x80   :  { %3296 = vst [vmem:[#allocation52_spill] sm:$0xff] %v2062_v4  ;;  %v2069_v23 = vsel %vm294_vm7, %v335_v57, 0.0  ;;  %v3300_v53 = vsub.f32 %v1645_v1, %v1613_v17  ;;  %v442_v57 = vmul.f32 %v1940_v6, %v3299_v38 }
  0x81   :  { %v341_v56 = vmul.f32 %v1194_v61, %v3297_v59  ;;  %3298 = vst [vmem:[#allocation53_spill] sm:$0xff] %v2069_v23  ;;  %v2082_v4 = vsel %vm295_vm8, %v337_v10, 0.0  ;;  %v1200_v61 = vpop.eup %1199  ;;  %v3302_v59 = vsub.f32 %v1645_v1, %v1631_v36  ;;  %v444_v10 = vmul.f32 %v1831_v40, %v3304_v49 }
  0x82   :  { %v343_v54 = vmul.f32 %v1196_v12, %v3300_v53  ;;  %3301 = vst [vmem:[#allocation29_spill] sm:$0xff] %v2082_v4  ;;  %v443_v12 = vmul.f32 %v385_v37, %v3299_v38  ;;  %v3305_v53 = vsub.f32 %v1645_v1, %v1638_v20  ;;  %v461_v20 = vsel %vm167_vm0, %v440_v39, 0.0 }
  0x83   :  { %v345_v23 = vmul.f32 %v1198_v45, %v3302_v59  ;;  %v2093_v19 = vsel %vm297_vm9, %v341_v56, 0.0  ;;  %v445_v45 = vmul.f32 %v1875_v29, %v3304_v49  ;;  %v447_v59 = vmul.f32 %v385_v37, %v3304_v49 }
  0x84   :  { %3303 = vst [vmem:[#allocation54_spill] sm:$0xff] %v2093_v19  ;;  %v347_v4 = vmul.f32 %v1200_v61, %v3305_v53  ;;  %v2103_v17 = vsel %vm298_vm10, %v343_v54, 0.0  ;;  %v3308_v19 = vld [vmem:[#allocation31_spill] sm:$0xff]  ;;  %v473_v39 = vsel %vm167_vm0, %v1975_v2, 0.0 }
  0x85   :  { %3306 = vst [vmem:[#allocation30_spill] sm:$0xff] %v2103_v17  ;;  %v2111_v56 = vsel %vm299_vm11, %v345_v23, 0.0  ;;  %v2116_v1 = vmul.f32 %v1831_v40, %v3308_v19  ;;  %v2120_v41 = vmul.f32 %v1875_v29, %v3308_v19  ;;  %v2128_v61 = vmul.f32 %v1940_v6, %v3308_v19  ;;  %v3310_v23 = vld [vmem:[#allocation32_spill] sm:$0xff] }
  0x86   :  { %3307 = vst [vmem:[#allocation55_spill] sm:$0xff] %v2111_v56  ;;  %v2124_v54 = vsel %vm300_vm12, %v347_v4, 0.0  ;;  %v2131_v31 = vmul.f32 %v385_v37, %v3308_v19  ;;  %v2135_v53 = vmul.f32 %v1831_v40, %v3310_v23  ;;  %v2139_v56 = vmul.f32 %v1875_v29, %v3310_v23 }
  0x87   :  { %3309 = vst [vmem:[#allocation31_spill] sm:$0xff] %v2124_v54  ;;  %v2143_v51 = vmul.f32 %v1940_v6, %v3310_v23  ;;  %v2146_v4 = vmul.f32 %v385_v37, %v3310_v23  ;;  %v456_v54 = vsel %vm167_vm0, %v1843_v62, 0.0  ;;  %v457_v17 = vsel %vm167_vm0, %v1903_v3, 0.0 }
  0x88   :  { %v459_v40 = vsel %vm167_vm0, %v1968_v21, 0.0  ;;  %v463_v29 = vsel %vm167_vm0, %v1846_v63, 0.0  ;;  %v458_v36 = vadd.f32 %v457_v17, %v456_v54  ;;  %v464_v6 = vsel %vm167_vm0, %v1906_v33, 0.0 }
  0x89   :  { %v466_v37 = vsel %vm167_vm0, %v1972_v5, 0.0  ;;  %v468_v62 = vsel %vm167_vm0, %v441_v55, 0.0  ;;  %v465_v23 = vadd.f32 %v464_v6, %v463_v29  ;;  %v470_v3 = vsel %vm167_vm0, %v1850_v46, 0.0 }
  0x8a   :  { %v471_v21 = vsel %vm167_vm0, %v1910_v0, 0.0  ;;  %v460_v63 = vadd.f32 %v459_v40, %v458_v36  ;;  %v475_v54 = vsel %vm167_vm0, %v442_v57, 0.0  ;;  %v477_v33 = vsel %vm167_vm0, %v1854_v43, 0.0 }
  0x8b   :  { %v472_v17 = vadd.f32 %v471_v21, %v470_v3  ;;  %v467_v5 = vadd.f32 %v466_v37, %v465_v23  ;;  %v478_v55 = vsel %vm167_vm0, %v1914_v27, 0.0  ;;  %v480_v46 = vsel %vm167_vm0, %v1986_v58, 0.0 }
  0x8c   :  { %v482_v29 = vsel %vm167_vm0, %v443_v12, 0.0  ;;  %v2176_v0 = vadd.f32 %v461_v20, %v460_v63  ;;  %v479_v2 = vadd.f32 %v478_v55, %v477_v33  ;;  %v484_v36 = vsel %vm167_vm0, %v1857_v25, 0.0 }
  0x8d   :  { %v474_v6 = vadd.f32 %v473_v39, %v472_v17  ;;  %v2180_v57 = vadd.f32 %v468_v62, %v467_v5  ;;  %v485_v43 = vsel %vm167_vm0, %v1917_v7, 0.0  ;;  %v487_v27 = vsel %vm167_vm0, %v1990_v24, 0.0 }
  0x8e   :  { %v489_v23 = vsel %vm167_vm0, %v444_v10, 0.0  ;;  %v481_v12 = vadd.f32 %v480_v46, %v479_v2  ;;  %v486_v20 = vadd.f32 %v485_v43, %v484_v36  ;;  %v491_v40 = vsel %vm167_vm0, %v1860_v11, 0.0  ;;  %v3311_v43 = vld [vmem:[#allocation49_spill] sm:$0xff] }
  0x8f   :  { %v2187_v58 = vadd.f32 %v475_v54, %v474_v6  ;;  %v492_v25 = vsel %vm167_vm0, %v1920_v34, 0.0  ;;  %v494_v37 = vsel %vm167_vm0, %v2001_v13, 0.0  ;;  %v496_v7 = vsel %vm167_vm0, %v445_v45, 0.0 }
  0x90   :  { %v498_v24 = vsel %vm167_vm0, %v1864_v47, 0.0  ;;  %v2198_v62 = vadd.f32 %v482_v29, %v481_v12  ;;  %v488_v10 = vadd.f32 %v487_v27, %v486_v20  ;;  %v493_v3 = vadd.f32 %v492_v25, %v491_v40  ;;  %v3312_v27 = vld [vmem:[#allocation22_spill] sm:$0xff]  ;;  %v3313_v12 = vld [vmem:[#allocation40_spill] sm:$0xff] }
  0x91   :  { %v499_v21 = vsel %vm167_vm0, %v1924_v42, 0.0  ;;  %v501_v11 = vsel %vm167_vm0, %v2004_v16, 0.0  ;;  %v503_v34 = vsel %vm167_vm0, %v446_v30, 0.0  ;;  %v505_v13 = vsel %vm167_vm0, %v1868_v48, 0.0 }
  0x92   :  { %v500_v39 = vadd.f32 %v499_v21, %v498_v24  ;;  %v2207_v45 = vadd.f32 %v489_v23, %v488_v10  ;;  %v495_v63 = vadd.f32 %v494_v37, %v493_v3  ;;  %v506_v47 = vsel %vm167_vm0, %v1928_v60, 0.0  ;;  %v3315_v10 = vld [vmem:[#allocation41_spill] sm:$0xff] }
  0x93   :  { %v508_v17 = vsel %vm167_vm0, %v2015_v18, 0.0  ;;  %v507_v42 = vadd.f32 %v506_v47, %v505_v13  ;;  %v510_v33 = vsel %vm167_vm0, %v447_v59, 0.0  ;;  %v512_v16 = vsel %vm167_vm0, %v1871_v28, 0.0  ;;  %v3316_v13 = vld [vmem:[#allocation34_spill] sm:$0xff] }
  0x94   :  { %v502_v54 = vadd.f32 %v501_v11, %v500_v39  ;;  %v2216_v30 = vadd.f32 %v496_v7, %v495_v63  ;;  %v513_v48 = vsel %vm167_vm0, %v1931_v9, 0.0  ;;  %v515_v5 = vsel %vm167_vm0, %v2019_v15, 0.0  ;;  %v3314_v7 = vld [vmem:[#allocation23_spill] sm:$0xff]  ;;  %v3317_v63 = vld [vmem:[#allocation42_spill] sm:$0xff] }
  0x95   :  { %v517_v60 = vsel %vm167_vm0, %v2116_v1, 0.0  ;;  %v509_v18 = vadd.f32 %v508_v17, %v507_v42  ;;  %v514_v46 = vadd.f32 %v513_v48, %v512_v16  ;;  %v519_v59 = vsel %vm167_vm0, %v1878_v50, 0.0  ;;  %v3319_v48 = vld [vmem:[#allocation43_spill] sm:$0xff] }
  0x96   :  { %v2224_v55 = vadd.f32 %v503_v34, %v502_v54  ;;  %v520_v28 = vsel %vm167_vm0, %v1934_v52, 0.0  ;;  %v522_v29 = vsel %vm167_vm0, %v2030_v22, 0.0  ;;  %v524_v9 = vsel %vm167_vm0, %v2120_v41, 0.0 }
  0x97   :  { %v526_v15 = vsel %vm167_vm0, %v1882_v32, 0.0  ;;  %v2236_v1 = vadd.f32 %v510_v33, %v509_v18  ;;  %v516_v6 = vadd.f32 %v515_v5, %v514_v46  ;;  %v521_v2 = vadd.f32 %v520_v28, %v519_v59  ;;  %v3320_v18 = vld [vmem:[#allocation52_spill] sm:$0xff]  ;;  %v3321_v59 = vld [vmem:[#allocation39_spill] sm:$0xff] }
  0x98   :  { %v527_v36 = vsel %vm167_vm0, %v1938_v44, 0.0  ;;  %v529_v52 = vsel %vm167_vm0, %v3311_v43, 0.0  ;;  %v531_v22 = vsel %vm167_vm0, %v2128_v61, 0.0  ;;  %v533_v41 = vsel %vm167_vm0, %v3312_v27, 0.0  ;;  %v3323_v43 = vld [vmem:[#allocation15_spill] sm:$0xff] }
  0x99   :  { %v528_v50 = vadd.f32 %v527_v36, %v526_v15  ;;  %v2246_v23 = vadd.f32 %v517_v60, %v516_v6  ;;  %v523_v32 = vadd.f32 %v522_v29, %v521_v2  ;;  %v534_v20 = vsel %vm167_vm0, %v3313_v12, 0.0 }
  0x9a   :  { %v536_v40 = vsel %vm167_vm0, %v2044_v14, 0.0  ;;  %v535_v25 = vadd.f32 %v534_v20, %v533_v41  ;;  %v538_v37 = vsel %vm167_vm0, %v2131_v31, 0.0  ;;  %v540_v61 = vsel %vm167_vm0, %v3314_v7, 0.0  ;;  %v3325_v41 = vld [vmem:[#allocation17_spill] sm:$0xff] }
  0x9b   :  { %v530_v44 = vadd.f32 %v529_v52, %v528_v50  ;;  %v2256_v24 = vadd.f32 %v524_v9, %v523_v32  ;;  %v541_v3 = vsel %vm167_vm0, %v3315_v10, 0.0  ;;  %v543_v21 = vsel %vm167_vm0, %v2048_v8, 0.0  ;;  %v3318_v8 = vld [vmem:[#allocation38_spill] sm:$0xff]  ;;  %v3322_v9 = vld [vmem:[#allocation44_spill] sm:$0xff]  ;;  %v3329_v7 = vld [vmem:[#allocation21_spill] sm:$0xff] }
  0x9c   :  { %v545_v39 = vsel %vm167_vm0, %v2135_v53, 0.0  ;;  %v537_v11 = vadd.f32 %v536_v40, %v535_v25  ;;  %v542_v34 = vadd.f32 %v541_v3, %v540_v61  ;;  %v547_v31 = vsel %vm167_vm0, %v3316_v13, 0.0  ;;  %v3327_v40 = vld [vmem:[#allocation19_spill] sm:$0xff]  ;;  %v3328_v25 = vld [vmem:[#allocation20_spill] sm:$0xff] }
  0x9d   :  { %v2264_v14 = vadd.f32 %v531_v22, %v530_v44  ;;  %v548_v47 = vsel %vm167_vm0, %v3317_v63, 0.0  ;;  %v550_v17 = vsel %vm167_vm0, %v2059_v35, 0.0  ;;  %v552_v54 = vsel %vm167_vm0, %v2139_v56, 0.0  ;;  %v3324_v22 = vld [vmem:[#allocation16_spill] sm:$0xff]  ;;  %v3333_v13 = vld [vmem:[#allocation27_spill] sm:$0xff] }
  0x9e   :  { %v554_v42 = vsel %vm167_vm0, %v3318_v8, 0.0  ;;  %v2276_v53 = vadd.f32 %v538_v37, %v537_v11  ;;  %v544_v33 = vadd.f32 %v543_v21, %v542_v34  ;;  %v549_v16 = vadd.f32 %v548_v47, %v547_v31  ;;  %v3330_v10 = vld [vmem:[#allocation24_spill] sm:$0xff] }
  0x9f   :  { %v555_v5 = vsel %vm167_vm0, %v3319_v48, 0.0  ;;  %v557_v46 = vsel %vm167_vm0, %v3320_v18, 0.0  ;;  %v559_v35 = vsel %vm167_vm0, %v2143_v51, 0.0  ;;  %v561_v56 = vsel %vm167_vm0, %v3321_v59, 0.0  ;;  %v3334_v63 = vld [vmem:[#allocation28_spill] sm:$0xff] }
  0xa0   :  { %v556_v60 = vadd.f32 %v555_v5, %v554_v42  ;;  %v2286_v28 = vadd.f32 %v545_v39, %v544_v33  ;;  %v551_v29 = vadd.f32 %v550_v17, %v549_v16  ;;  %v562_v15 = vsel %vm167_vm0, %v3322_v9, 0.0  ;;  %v3332_v39 = vld [vmem:[#allocation26_spill] sm:$0xff]  ;;  %v3335_v8 = vld [vmem:[#allocation32_spill] sm:$0xff] }
  0xa1   :  { %v564_v6 = vsel %vm167_vm0, %v2073_v26, 0.0  ;;  %v563_v36 = vadd.f32 %v562_v15, %v561_v56  ;;  %v566_v50 = vsel %vm167_vm0, %v2146_v4, 0.0  ;;  %v2296_v51 = vmul.f32 %v2176_v0, %v3323_v43  ;;  %v3326_v26 = vld [vmem:[#allocation18_spill] sm:$0xff]  ;;  %v2428_v15 = vld [vmem:[#allocation2] sm:$0x1] }
  0xa2   :  { %v558_v2 = vadd.f32 %v557_v46, %v556_v60  ;;  %v2298_v52 = vadd.f32 %v552_v54, %v551_v29  ;;  %v2302_v27 = vmul.f32 %v2176_v0, %v3324_v22  ;;  %v2306_v32 = vmul.f32 %v2176_v0, %v3325_v41  ;;  %3336 = vst [vmem:[#allocation49_spill] sm:$0xff] %v2428_v15 }
  0xa3   :  { %v2310_v12 = vmul.f32 %v2176_v0, %v3326_v26  ;;  %v565_v4 = vadd.f32 %v564_v6, %v563_v36  ;;  %v2316_v44 = vmul.f32 %v2180_v57, %v3327_v40  ;;  %v2320_v37 = vmul.f32 %v2180_v57, %v3328_v25  ;;  %v3331_v0 = vld [vmem:[#allocation25_spill] sm:$0xff]  ;;  %v2434_v6 = vld [vmem:[#allocation2 + $0x1] sm:$0x1]  ;;  %v2440_v36 = vld [vmem:[#allocation2 + $0x2] sm:$0x1] }
  0xa4   :  { %v2312_v20 = vadd.f32 %v559_v35, %v558_v2  ;;  %v2324_v61 = vmul.f32 %v2180_v57, %v3329_v7  ;;  %v2328_v3 = vmul.f32 %v2180_v57, %v3330_v10  ;;  %v2332_v21 = vmul.f32 %v2187_v58, %v3331_v0  ;;  %3337 = vst [vmem:[#allocation22_spill] sm:$0xff] %v2434_v6 }
  0xa5   :  { %v2336_v11 = vmul.f32 %v2187_v58, %v3332_v39  ;;  %v2338_v34 = vadd.f32 %v566_v50, %v565_v4  ;;  %v2342_v31 = vmul.f32 %v2187_v58, %v3333_v13  ;;  %v2346_v47 = vmul.f32 %v2187_v58, %v3334_v63  ;;  %3338 = vst [vmem:[#allocation40_spill] sm:$0xff] %v2440_v36 }
  0xa6   :  { %v2350_v57 = vmul.f32 %v2198_v62, %v3299_v38  ;;  %v2354_v17 = vmul.f32 %v2198_v62, %v3304_v49  ;;  %v2358_v54 = vmul.f32 %v2198_v62, %v3308_v19  ;;  %v2362_v42 = vmul.f32 %v2198_v62, %v3335_v8 }
  0xa7   :  { %v2366_v58 = vmul.f32 %v2207_v45, %v3323_v43  ;;  %v2370_v33 = vmul.f32 %v2207_v45, %v3324_v22  ;;  %v2374_v16 = vmul.f32 %v2207_v45, %v3325_v41  ;;  %v2378_v48 = vmul.f32 %v2207_v45, %v3326_v26 }
  0xa8   :  { %v2382_v62 = vmul.f32 %v2216_v30, %v3327_v40  ;;  %v2386_v5 = vmul.f32 %v2216_v30, %v3328_v25  ;;  %v2390_v60 = vmul.f32 %v2216_v30, %v3329_v7  ;;  %v2394_v18 = vmul.f32 %v2216_v30, %v3330_v10 }
  0xa9   :  { %v2398_v45 = vmul.f32 %v2224_v55, %v3331_v0  ;;  %v2402_v46 = vmul.f32 %v2224_v55, %v3332_v39  ;;  %v2406_v35 = vmul.f32 %v2224_v55, %v3333_v13  ;;  %v2410_v59 = vmul.f32 %v2224_v55, %v3334_v63 }
  0xaa   :  { %v2414_v30 = vmul.f32 %v2236_v1, %v3299_v38  ;;  %v2418_v56 = vmul.f32 %v2236_v1, %v3304_v49  ;;  %v2422_v29 = vmul.f32 %v2236_v1, %v3308_v19  ;;  %v2426_v9 = vmul.f32 %v2236_v1, %v3335_v8  ;;  %v2446_v1 = vld [vmem:[#allocation2 + $0x3] sm:$0x1] }
  0xab   :  { %v2432_v55 = vmul.f32 %v2428_v15, %v2246_v23  ;;  %v2438_v2 = vmul.f32 %v2434_v6, %v2246_v23  ;;  %v2444_v50 = vmul.f32 %v2440_v36, %v2246_v23  ;;  %3340 = vst [vmem:[#allocation41_spill] sm:$0xff] %v2446_v1  ;;  %v2450_v43 = vmul.f32 %v2446_v1, %v2246_v23 }
  0xac   :  { %v2454_v22 = vmul.f32 %v2256_v24, %v3327_v40  ;;  %v2458_v41 = vmul.f32 %v2256_v24, %v3328_v25  ;;  %v2462_v26 = vmul.f32 %v2256_v24, %v3329_v7  ;;  %v2466_v4 = vmul.f32 %v2256_v24, %v3330_v10 }
  0xad   :  { %3339 = vst [vmem:[#allocation23_spill] sm:$0xff] %v2444_v50  ;;  %3341 = vst [vmem:[#allocation34_spill] sm:$0xff] %v2450_v43  ;;  %v2470_v23 = vmul.f32 %v2264_v14, %v3331_v0  ;;  %v2474_v40 = vmul.f32 %v2264_v14, %v3332_v39  ;;  %v2478_v25 = vmul.f32 %v2264_v14, %v3333_v13 }
  0xae   :  { %3342 = vst [vmem:[#allocation42_spill] sm:$0xff] %v2462_v26  ;;  %3343 = vst [vmem:[#allocation38_spill] sm:$0xff] %v2466_v4  ;;  %v2482_v7 = vmul.f32 %v2264_v14, %v3334_v63  ;;  %v2486_v24 = vmul.f32 %v2276_v53, %v3299_v38  ;;  %v2490_v4 = vmul.f32 %v2276_v53, %v3304_v49 }
  0xaf   :  { %3344 = vst [vmem:[#allocation43_spill] sm:$0xff] %v2478_v25  ;;  %v2494_v43 = vmul.f32 %v2276_v53, %v3308_v19  ;;  %v2498_v26 = vmul.f32 %v2276_v53, %v3335_v8  ;;  %v2502_v14 = vmul.f32 %v2428_v15, %v2286_v28  ;;  %v2510_v25 = vmul.f32 %v2440_v36, %v2286_v28  ;;  %v2522_v15 = vld [vmem:[#allocation2 + $0x5] sm:$0x1]  ;;  %v2528_v36 = vld [vmem:[#allocation2 + $0x6] sm:$0x1] }
  0xb0   :  { %3345 = vst [vmem:[#allocation52_spill] sm:$0xff] %v2482_v7  ;;  %v2506_v7 = vmul.f32 %v2434_v6, %v2286_v28  ;;  %v2514_v50 = vmul.f32 %v2446_v1, %v2286_v28  ;;  %3349 = vst [vmem:[#allocation16_spill] sm:$0xff] %v2522_v15  ;;  %v2526_v6 = vmul.f32 %v2522_v15, %v2298_v52 }
  0xb1   :  { %3346 = vst [vmem:[#allocation39_spill] sm:$0xff] %v2494_v43  ;;  %v2516_v43 = vld [vmem:[#allocation2 + $0x4] sm:$0x1]  ;;  %3350 = vst [vmem:[#allocation17_spill] sm:$0xff] %v2528_v36  ;;  %v2532_v28 = vmul.f32 %v2528_v36, %v2298_v52  ;;  %v2536_v1 = vmul.f32 %v2298_v52, %v3330_v10  ;;  %v2548_v15 = vmul.f32 %v2312_v20, %v3333_v13 }
  0xb2   :  { %3347 = vst [vmem:[#allocation44_spill] sm:$0xff] %v2514_v50  ;;  %3348 = vst [vmem:[#allocation15_spill] sm:$0xff] %v2516_v43  ;;  %v2520_v53 = vmul.f32 %v2516_v43, %v2298_v52  ;;  %v2540_v43 = vmul.f32 %v2312_v20, %v3331_v0  ;;  %v2544_v50 = vmul.f32 %v2312_v20, %v3332_v39 }
  0xb3   :  { %v2552_v36 = vmul.f32 %v2312_v20, %v3334_v63  ;;  %v2556_v52 = vmul.f32 %v2338_v34, %v3299_v38 }
  0xb4   :  { %1294 = shalt.err (!%p1291_p0)
}
  0xb5   :  { %s1295_s5 = scalar_lea.hbm %s3165_s3, 256 }
  0xb6   :  { %p1296_p1 = scmp.ne.s32.totalorder %s3165_s3, %s1295_s5  ;;  %p1299_p2 = scmp.lt.u32.totalorder %s1295_s5, %s3165_s3 }
  0xb8   :  { %p1301_p3 = pnand %p1299_p2, %p1296_p1 }
  0xba   :  { %1304 = shalt.err (!%p1301_p3)
}
  0xbb   :  { %1139 = dma.vmem_to_hbm [thread:$0]  %s1134_s25, 256, %s3165_s3, [#allocation4], %s1337_s27, %s1337_s27, %s1338_s28   ;;  %v2575_v38 = vmul.f32 %v2338_v34, %v3304_v49  ;;  %v2579_v20 = vmul.f32 %v2338_v34, %v3308_v19  ;;  %v2583_v10 = vmul.f32 %v2338_v34, %v3335_v8  ;;  %v632_v0 = vsel %vm167_vm0, %v2296_v51, 0.0 }
  0xbc   :  { %v633_v39 = vsel %vm167_vm0, %v2316_v44, 0.0  ;;  %v635_v13 = vsel %vm167_vm0, %v2332_v21, 0.0  ;;  %v637_v49 = vsel %vm167_vm0, %v2350_v57, 0.0  ;;  %v639_v19 = vsel %vm167_vm0, %v2302_v27, 0.0  ;;  %s1341_s3 = smov [#allocation9]  }
  0xbd   :  { %3351 = vst [vmem:[#allocation18_spill] sm:$0xff] %v2583_v10  ;;  %v634_v63 = vadd.f32 %v633_v39, %v632_v0  ;;  %v640_v34 = vsel %vm167_vm0, %v2320_v37, 0.0  ;;  %v642_v8 = vsel %vm167_vm0, %v2336_v11, 0.0  ;;  %v644_v51 = vsel %vm167_vm0, %v2354_v17, 0.0  ;;  %s1145_s12 = sshll.u32 %s1341_s3, 4  ;;  %s1146_s12 = int_to_ptr.vmem [resolvable:$true] %s1145_s12 }
  0xbe   :  { %v641_v44 = vadd.f32 %v640_v34, %v639_v19  ;;  %v646_v21 = vsel %vm167_vm0, %v2306_v32, 0.0  ;;  %v647_v57 = vsel %vm167_vm0, %v2324_v61, 0.0  ;;  %v649_v27 = vsel %vm167_vm0, %v2342_v31, 0.0  ;;  %s1305_s1 = scalar_lea.vmem %s1146_s12, 256  ;;  %p1310_p5 = scmp.lt.s32.totalorder %s1146_s12, %s1146_s12 }
  0xbf   :  { %v636_v0 = vadd.f32 %v635_v13, %v634_v63  ;;  %v648_v39 = vadd.f32 %v647_v57, %v646_v21  ;;  %v651_v37 = vsel %vm167_vm0, %v2358_v54, 0.0  ;;  %v653_v11 = vsel %vm167_vm0, %v2310_v12, 0.0  ;;  %p1306_p4 = scmp.ne.s32.totalorder %s1146_s12, %s1305_s1  ;;  %p1311_p6 = scmp.lt.s32.totalorder %s1305_s1, %s1305_s1 }
  0xc0   :  { %v643_v10 = vadd.f32 %v642_v8, %v641_v44  ;;  %v654_v17 = vsel %vm167_vm0, %v2328_v3, 0.0  ;;  %v656_v32 = vsel %vm167_vm0, %v2346_v47, 0.0  ;;  %v658_v61 = vsel %vm167_vm0, %v2362_v42, 0.0 }
  0xc1   :  { %v2617_v19 = vadd.f32 %v637_v49, %v636_v0  ;;  %v650_v31 = vadd.f32 %v649_v27, %v648_v39  ;;  %v655_v13 = vadd.f32 %v654_v17, %v653_v11  ;;  %v660_v54 = vsel %vm167_vm0, %v2366_v58, 0.0  ;;  %p1312_p7 = por %p1311_p6, %p1310_p5 }
  0xc2   :  { %v2621_v63 = vadd.f32 %v644_v51, %v643_v10  ;;  %v661_v12 = vsel %vm167_vm0, %v2382_v62, 0.0  ;;  %v663_v3 = vsel %vm167_vm0, %v2398_v45, 0.0  ;;  %v665_v47 = vsel %vm167_vm0, %v2414_v30, 0.0 }
  0xc3   :  { %v2629_v34 = vadd.f32 %v651_v37, %v650_v31  ;;  %v657_v42 = vadd.f32 %v656_v32, %v655_v13  ;;  %v662_v49 = vadd.f32 %v661_v12, %v660_v54  ;;  %v667_v8 = vsel %vm167_vm0, %v2370_v33, 0.0  ;;  %v3352_v31 = vld [vmem:[#allocation23_spill] sm:$0xff]  ;;  %v3353_v12 = vld [vmem:[#allocation42_spill] sm:$0xff]  ;;  %p1313_p8 = pnand %p1312_p7, %p1306_p4 }
  0xc4   :  { %v668_v58 = vsel %vm167_vm0, %v2386_v5, 0.0  ;;  %v670_v10 = vsel %vm167_vm0, %v2402_v46, 0.0  ;;  %v672_v62 = vsel %vm167_vm0, %v2418_v56, 0.0  ;;  %v674_v45 = vsel %vm167_vm0, %v2374_v16, 0.0 }
  0xc5   :  { %v2641_v30 = vadd.f32 %v658_v61, %v657_v42  ;;  %v664_v51 = vadd.f32 %v663_v3, %v662_v49  ;;  %v669_v44 = vadd.f32 %v668_v58, %v667_v8  ;;  %v675_v21 = vsel %vm167_vm0, %v2390_v60, 0.0 }
  0xc6   :  { %v676_v33 = vadd.f32 %v675_v21, %v674_v45  ;;  %v677_v5 = vsel %vm167_vm0, %v2406_v35, 0.0  ;;  %v679_v46 = vsel %vm167_vm0, %v2422_v29, 0.0  ;;  %v681_v56 = vsel %vm167_vm0, %v2378_v48, 0.0  ;;  %v3358_v45 = vld [vmem:[#allocation52_spill] sm:$0xff] }
  0xc7   :  { %v2651_v57 = vadd.f32 %v665_v47, %v664_v51  ;;  %v671_v16 = vadd.f32 %v670_v10, %v669_v44  ;;  %v682_v27 = vsel %vm167_vm0, %v2394_v18, 0.0  ;;  %v684_v0 = vsel %vm167_vm0, %v2410_v59, 0.0  ;;  %v3357_v10 = vld [vmem:[#allocation38_spill] sm:$0xff] }
  0xc8   :  { %v678_v60 = vadd.f32 %v677_v5, %v676_v33  ;;  %v683_v39 = vadd.f32 %v682_v27, %v681_v56  ;;  %v686_v35 = vsel %vm167_vm0, %v2426_v9, 0.0  ;;  %v688_v29 = vsel %vm167_vm0, %v2432_v55, 0.0 }
  0xc9   :  { %v2661_v37 = vadd.f32 %v672_v62, %v671_v16  ;;  %v689_v48 = vsel %vm167_vm0, %v2454_v22, 0.0  ;;  %v691_v11 = vsel %vm167_vm0, %v2470_v23, 0.0  ;;  %v693_v18 = vsel %vm167_vm0, %v2486_v24, 0.0 }
  0xca   :  { %v680_v59 = vadd.f32 %v679_v46, %v678_v60  ;;  %v685_v17 = vadd.f32 %v684_v0, %v683_v39  ;;  %v690_v32 = vadd.f32 %v689_v48, %v688_v29  ;;  %v695_v9 = vsel %vm167_vm0, %v2438_v2, 0.0  ;;  %v3354_v2 = vld [vmem:[#allocation43_spill] sm:$0xff] }
  0xcb   :  { %v696_v55 = vsel %vm167_vm0, %v2458_v41, 0.0  ;;  %v698_v61 = vsel %vm167_vm0, %v2474_v40, 0.0  ;;  %v700_v22 = vsel %vm167_vm0, %v2490_v4, 0.0  ;;  %v702_v23 = vsel %vm167_vm0, %v3352_v31, 0.0  ;;  %v3355_v41 = vld [vmem:[#allocation39_spill] sm:$0xff]  ;;  %v3356_v40 = vld [vmem:[#allocation34_spill] sm:$0xff] }
  0xcc   :  { %v687_v13 = vadd.f32 %v686_v35, %v685_v17  ;;  %v692_v24 = vadd.f32 %v691_v11, %v690_v32  ;;  %v697_v54 = vadd.f32 %v696_v55, %v695_v9  ;;  %v703_v3 = vsel %vm167_vm0, %v3353_v12, 0.0  ;;  %v3364_v12 = vld [vmem:[#allocation47_spill] sm:$0xff] }
  0xcd   :  { %v704_v47 = vadd.f32 %v703_v3, %v702_v23  ;;  %v705_v42 = vsel %vm167_vm0, %v3354_v2, 0.0  ;;  %v707_v49 = vsel %vm167_vm0, %v3355_v41, 0.0  ;;  %v709_v8 = vsel %vm167_vm0, %v3356_v40, 0.0  ;;  %v3362_v23 = vld [vmem:[#allocation45_spill] sm:$0xff]  ;;  %v3365_v2 = vld [vmem:[#allocation48_spill] sm:$0xff]  ;;  %v3368_v40 = vld [vmem:[#allocation51_spill] sm:$0xff] }
  0xce   :  { %v694_v4 = vadd.f32 %v693_v18, %v692_v24  ;;  %v699_v58 = vadd.f32 %v698_v61, %v697_v54  ;;  %v710_v62 = vsel %vm167_vm0, %v3357_v10, 0.0  ;;  %v712_v51 = vsel %vm167_vm0, %v3358_v45, 0.0  ;;  %v3360_v61 = vld [vmem:[#allocation18_spill] sm:$0xff]  ;;  %v3371_v45 = vld [vmem:[#allocation36_spill] sm:$0xff] }
  0xcf   :  { %v706_v44 = vadd.f32 %v705_v42, %v704_v47  ;;  %v711_v21 = vadd.f32 %v710_v62, %v709_v8  ;;  %v714_v33 = vsel %vm167_vm0, %v2498_v26, 0.0  ;;  %v716_v5 = vsel %vm167_vm0, %v2502_v14, 0.0  ;;  %v3363_v54 = vld [vmem:[#allocation46_spill] sm:$0xff]  ;;  %v3369_v8 = vld [vmem:[#allocation53_spill] sm:$0xff] }
  0xd0   :  { %v701_v46 = vadd.f32 %v700_v22, %v699_v58  ;;  %v717_v56 = vsel %vm167_vm0, %v2520_v53, 0.0  ;;  %v719_v16 = vsel %vm167_vm0, %v2540_v43, 0.0  ;;  %v721_v27 = vsel %vm167_vm0, %v2556_v52, 0.0 }
  0xd1   :  { %v708_v0 = vadd.f32 %v707_v49, %v706_v44  ;;  %v713_v60 = vadd.f32 %v712_v51, %v711_v21  ;;  %v718_v39 = vadd.f32 %v717_v56, %v716_v5  ;;  %v723_v35 = vsel %vm167_vm0, %v2506_v7, 0.0  ;;  %v3372_v51 = vld [vmem:[#allocation54_spill] sm:$0xff] }
  0xd2   :  { %v724_v26 = vsel %vm167_vm0, %v2526_v6, 0.0  ;;  %v726_v14 = vsel %vm167_vm0, %v2544_v50, 0.0  ;;  %v728_v53 = vsel %vm167_vm0, %v2575_v38, 0.0  ;;  %v730_v43 = vsel %vm167_vm0, %v2510_v25, 0.0  ;;  %v3359_v50 = vld [vmem:[#allocation44_spill] sm:$0xff] }
  0xd3   :  { %v715_v29 = vadd.f32 %v714_v33, %v713_v60  ;;  %v720_v52 = vadd.f32 %v719_v16, %v718_v39  ;;  %v725_v48 = vadd.f32 %v724_v26, %v723_v35  ;;  %v731_v11 = vsel %vm167_vm0, %v2532_v28, 0.0  ;;  %v3377_v16 = vld [vmem:[#allocation37_spill] sm:$0xff]  ;;  %v3378_v39 = vld [vmem:[#allocation22_spill] sm:$0xff] }
  0xd4   :  { %v732_v18 = vadd.f32 %v731_v11, %v730_v43  ;;  %v733_v7 = vsel %vm167_vm0, %v2548_v15, 0.0  ;;  %v735_v6 = vsel %vm167_vm0, %v2579_v20, 0.0  ;;  %v737_v17 = vsel %vm167_vm0, %v3359_v50, 0.0  ;;  %v3361_v15 = vld [vmem:[#allocation33_spill] sm:$0xff]  ;;  %v3379_v43 = vld [vmem:[#allocation40_spill] sm:$0xff] }
  0xd5   :  { %v722_v38 = vadd.f32 %v721_v27, %v720_v52  ;;  %v727_v32 = vadd.f32 %v726_v14, %v725_v48  ;;  %v738_v25 = vsel %vm167_vm0, %v2536_v1, 0.0  ;;  %v740_v9 = vsel %vm167_vm0, %v2552_v36, 0.0 }
  0xd6   :  { %v734_v55 = vadd.f32 %v733_v7, %v732_v18  ;;  %v739_v28 = vadd.f32 %v738_v25, %v737_v17  ;;  %v742_v22 = vsel %vm167_vm0, %v3360_v61, 0.0  ;;  %v2727_v31 = vmul.f32 %v3361_v15, %v2617_v19  ;;  %v3366_v19 = vld [vmem:[#allocation35_spill] sm:$0xff]  ;;  %v3380_v18 = vld [vmem:[#allocation41_spill] sm:$0xff] }
  0xd7   :  { %v729_v20 = vadd.f32 %v728_v53, %v727_v32  ;;  %v2731_v24 = vmul.f32 %v2621_v63, %v3362_v23  ;;  %v2735_v1 = vmul.f32 %v2629_v34, %v3363_v54  ;;  %v2739_v36 = vmul.f32 %v2641_v30, %v3364_v12  ;;  %v3367_v63 = vld [vmem:[#allocation50_spill] sm:$0xff]  ;;  %v3370_v30 = vld [vmem:[#allocation29_spill] sm:$0xff] }
  0xd8   :  { %v736_v3 = vadd.f32 %v735_v6, %v734_v55  ;;  %v741_v47 = vadd.f32 %v740_v9, %v739_v28  ;;  %v2743_v42 = vmul.f32 %v2651_v57, %v3365_v2  ;;  %v2747_v41 = vmul.f32 %v3366_v19, %v2661_v37  ;;  %v3373_v37 = vld [vmem:[#allocation30_spill] sm:$0xff] }
  0xd9   :  { %v2750_v49 = vmul.f32 %v680_v59, %v3367_v63  ;;  %v2753_v34 = vmul.f32 %v687_v13, %v3368_v40  ;;  %v2756_v58 = vmul.f32 %v694_v4, %v3369_v8  ;;  %v2759_v10 = vmul.f32 %v701_v46, %v3370_v30  ;;  %v3374_v59 = vld [vmem:[#allocation55_spill] sm:$0xff]  ;;  %v3376_v4 = vld [vmem:[#allocation49_spill] sm:$0xff] }
  0xda   :  { %v743_v62 = vadd.f32 %v742_v22, %v741_v47  ;;  %v2762_v57 = vmul.f32 %v3371_v45, %v708_v0  ;;  %v2765_v44 = vmul.f32 %v715_v29, %v3372_v51  ;;  %v2768_v21 = vmul.f32 %v722_v38, %v3373_v37  ;;  %v3375_v13 = vld [vmem:[#allocation31_spill] sm:$0xff] }
  0xdb   :  { %v2771_v33 = vmul.f32 %v729_v20, %v3374_v59  ;;  %v2774_v5 = vmul.f32 %v736_v3, %v3375_v13  ;;  %v760_v46 = vmul.f32 %v3376_v4, %v2727_v31  ;;  %v761_v56 = vmul.f32 %v3376_v4, %v2731_v24  ;;  %v3381_v37 = vld [vmem:[#allocation15_spill] sm:$0xff] }
  0xdc   :  { %v2781_v27 = vmul.f32 %v3377_v16, %v743_v62  ;;  %v762_v0 = vmul.f32 %v3376_v4, %v2735_v1  ;;  %v763_v60 = vmul.f32 %v3376_v4, %v2739_v36  ;;  %v764_v35 = vmul.f32 %v3378_v39, %v2743_v42 }
  0xdd   :  { %v765_v26 = vmul.f32 %v3378_v39, %v2747_v41  ;;  %v766_v14 = vmul.f32 %v3378_v39, %v2750_v49  ;;  %v767_v53 = vmul.f32 %v3378_v39, %v2753_v34  ;;  %v768_v29 = vmul.f32 %v3379_v43, %v2756_v58 }
  0xde   :  { %v769_v52 = vmul.f32 %v3379_v43, %v2759_v10  ;;  %v770_v48 = vmul.f32 %v3379_v43, %v2762_v57  ;;  %v771_v11 = vmul.f32 %v3379_v43, %v2765_v44  ;;  %v772_v7 = vmul.f32 %v3380_v18, %v2768_v21 }
  0xdf   :  { %v773_v6 = vmul.f32 %v3380_v18, %v2771_v33  ;;  %v774_v50 = vmul.f32 %v3380_v18, %v2774_v5  ;;  %v775_v17 = vmul.f32 %v3380_v18, %v2781_v27  ;;  %v824_v38 = vsel %vm167_vm0, %v760_v46, 0.0 }
  0xe0   :  { %v825_v32 = vsel %vm167_vm0, %v764_v35, 0.0  ;;  %v827_v25 = vsel %vm167_vm0, %v768_v29, 0.0  ;;  %v829_v9 = vsel %vm167_vm0, %v772_v7, 0.0  ;;  %v831_v55 = vsel %vm167_vm0, %v761_v56, 0.0 }
  0xe1   :  { %v826_v28 = vadd.f32 %v825_v32, %v824_v38  ;;  %v832_v61 = vsel %vm167_vm0, %v765_v26, 0.0  ;;  %v834_v22 = vsel %vm167_vm0, %v769_v52, 0.0  ;;  %v836_v15 = vsel %vm167_vm0, %v773_v6, 0.0  ;;  %v2847_v52 = vld [vmem:[#allocation2 + $0x8] sm:$0x1]  ;;  %v3383_v38 = vld [vmem:[#allocation17_spill] sm:$0xff] }
  0xe2   :  { %v833_v20 = vadd.f32 %v832_v61, %v831_v55  ;;  %v838_v23 = vsel %vm167_vm0, %v762_v0, 0.0  ;;  %v839_v54 = vsel %vm167_vm0, %v766_v14, 0.0  ;;  %v841_v12 = vsel %vm167_vm0, %v770_v48, 0.0 }
  0xe3   :  { %v828_v3 = vadd.f32 %v827_v25, %v826_v28  ;;  %v840_v47 = vadd.f32 %v839_v54, %v838_v23  ;;  %v843_v2 = vsel %vm167_vm0, %v774_v50, 0.0  ;;  %v845_v19 = vsel %vm167_vm0, %v763_v60, 0.0  ;;  %v2859_v28 = vld [vmem:[#allocation2 + $0xa] sm:$0x1]  ;;  %v2864_v23 = vld [vmem:[#allocation2 + $0x7] sm:$0x1] }
  0xe4   :  { %v835_v63 = vadd.f32 %v834_v22, %v833_v20  ;;  %v846_v40 = vsel %vm167_vm0, %v767_v53, 0.0  ;;  %v848_v8 = vsel %vm167_vm0, %v771_v11, 0.0  ;;  %v850_v30 = vsel %vm167_vm0, %v775_v17, 0.0  ;;  %v3382_v53 = vld [vmem:[#allocation16_spill] sm:$0xff] }
  0xe5   :  { %v830_v62 = vadd.f32 %v829_v9, %v828_v3  ;;  %v842_v45 = vadd.f32 %v841_v12, %v840_v47  ;;  %v847_v51 = vadd.f32 %v846_v40, %v845_v19  ;;  %v2829_v59 = vmul.f32 %v3381_v37, %v2727_v31  ;;  %v2850_v11 = vld [vmem:[#allocation2 + $0x9] sm:$0x1]  ;;  %v2868_v47 = vld [vmem:[#allocation2 + $0xb] sm:$0x1] }
  0xe6   :  { %v837_v13 = vadd.f32 %v836_v15, %v835_v63  ;;  %v2833_v46 = vmul.f32 %v3381_v37, %v2731_v24  ;;  %v2837_v56 = vmul.f32 %v3381_v37, %v2735_v1  ;;  %v2841_v16 = vmul.f32 %v3381_v37, %v2739_v36 }
  0xe7   :  { %v844_v0 = vadd.f32 %v843_v2, %v842_v45  ;;  %v849_v60 = vadd.f32 %v848_v8, %v847_v51  ;;  %v936_v35 = vmul.f32 %v3376_v4, %v830_v62  ;;  %v940_v26 = vmul.f32 %v3381_v37, %v830_v62 }
  0xe8   :  { %v937_v14 = vmul.f32 %v3378_v39, %v837_v13  ;;  %v941_v29 = vmul.f32 %v3382_v53, %v837_v13  ;;  %v944_v48 = vmul.f32 %v2847_v52, %v830_v62  ;;  %v945_v7 = vmul.f32 %v2850_v11, %v837_v13 }
  0xe9   :  { %v851_v6 = vadd.f32 %v850_v30, %v849_v60  ;;  %v938_v50 = vmul.f32 %v3379_v43, %v844_v0  ;;  %v1000_v17 = vsel %vm167_vm0, %v936_v35, 0.0  ;;  %v942_v32 = vmul.f32 %v3383_v38, %v844_v0 }
  0xea   :  { %v1001_v25 = vsel %vm167_vm0, %v937_v14, 0.0  ;;  %v1007_v9 = vsel %vm167_vm0, %v940_v26, 0.0  ;;  %v1008_v55 = vsel %vm167_vm0, %v941_v29, 0.0  ;;  %v946_v61 = vmul.f32 %v2859_v28, %v844_v0  ;;  %v2877_v14 = vld [vmem:[#allocation2 + $0xc] sm:$0x1] }
  0xeb   :  { %v939_v22 = vmul.f32 %v3380_v18, %v851_v6  ;;  %v1002_v15 = vadd.f32 %v1001_v25, %v1000_v17  ;;  %v1003_v20 = vsel %vm167_vm0, %v938_v50, 0.0  ;;  %v943_v54 = vmul.f32 %v2864_v23, %v851_v6  ;;  %v2880_v50 = vld [vmem:[#allocation2 + $0xd] sm:$0x1]  ;;  %v2883_v17 = vld [vmem:[#allocation2 + $0xe] sm:$0x1] }
  0xec   :  { %v1009_v12 = vadd.f32 %v1008_v55, %v1007_v9  ;;  %v1010_v3 = vsel %vm167_vm0, %v942_v32, 0.0  ;;  %v947_v2 = vmul.f32 %v2868_v47, %v851_v6  ;;  %v1014_v19 = vsel %vm167_vm0, %v944_v48, 0.0  ;;  %v2886_v9 = vld [vmem:[#allocation2 + $0xf] sm:$0x1] }
  0xed   :  { %v1004_v63 = vadd.f32 %v1003_v20, %v1002_v15  ;;  %v1005_v40 = vsel %vm167_vm0, %v939_v22, 0.0  ;;  %v1012_v8 = vsel %vm167_vm0, %v943_v54, 0.0  ;;  %v1015_v30 = vsel %vm167_vm0, %v945_v7, 0.0 }
  0xee   :  { %v1011_v45 = vadd.f32 %v1010_v3, %v1009_v12  ;;  %v1016_v51 = vadd.f32 %v1015_v30, %v1014_v19  ;;  %v1017_v60 = vsel %vm167_vm0, %v946_v61, 0.0  ;;  %v1019_v35 = vsel %vm167_vm0, %v947_v2, 0.0 }
  0xef   :  { %v1006_v26 = vadd.f32 %v1005_v40, %v1004_v63  ;;  %v948_v29 = vmul.f32 %v2877_v14, %v830_v62  ;;  %v949_v48 = vmul.f32 %v2880_v50, %v837_v13  ;;  %v950_v32 = vmul.f32 %v2883_v17, %v844_v0 }
  0xf0   :  { %v1013_v7 = vadd.f32 %v1012_v8, %v1011_v45  ;;  %v1018_v25 = vadd.f32 %v1017_v60, %v1016_v51  ;;  %v951_v55 = vmul.f32 %v2886_v9, %v851_v6  ;;  %v780_v61 = vmul.f32 %v3382_v53, %v2743_v42 }
  0xf1   :  { %1112 = vst [vmem:[#allocation9] sm:$0x1] %v1006_v26  ;;  %v1021_v62 = vsel %vm167_vm0, %v948_v29, 0.0  ;;  %v1022_v22 = vsel %vm167_vm0, %v949_v48, 0.0  ;;  %v1024_v13 = vsel %vm167_vm0, %v950_v32, 0.0  ;;  %v781_v15 = vmul.f32 %v3382_v53, %v2747_v41 }
  0xf2   :  { %1113 = vst [vmem:[#allocation9 + $0x1] sm:$0x1] %v1013_v7  ;;  %v1020_v0 = vadd.f32 %v1019_v35, %v1018_v25  ;;  %v1023_v20 = vadd.f32 %v1022_v22, %v1021_v62  ;;  %v1026_v54 = vsel %vm167_vm0, %v951_v55, 0.0  ;;  %v782_v6 = vmul.f32 %v3382_v53, %v2750_v49 }
  0xf3   :  { %v783_v12 = vmul.f32 %v3382_v53, %v2753_v34  ;;  %v784_v3 = vmul.f32 %v3383_v38, %v2756_v58  ;;  %v785_v2 = vmul.f32 %v3383_v38, %v2759_v10  ;;  %v786_v19 = vmul.f32 %v3383_v38, %v2762_v57 }
  0xf4   :  { %1114 = vst [vmem:[#allocation9 + $0x2] sm:$0x1] %v1020_v0  ;;  %v1025_v63 = vadd.f32 %v1024_v13, %v1023_v20  ;;  %v787_v40 = vmul.f32 %v3383_v38, %v2765_v44  ;;  %v788_v8 = vmul.f32 %v2864_v23, %v2768_v21  ;;  %v789_v30 = vmul.f32 %v2864_v23, %v2771_v33 }
  0xf5   :  { %v790_v45 = vmul.f32 %v2864_v23, %v2774_v5  ;;  %v791_v51 = vmul.f32 %v2864_v23, %v2781_v27  ;;  %v852_v60 = vsel %vm167_vm0, %v2829_v59, 0.0  ;;  %v853_v35 = vsel %vm167_vm0, %v780_v61, 0.0 }
  0xf6   :  { %v1027_v26 = vadd.f32 %v1026_v54, %v1025_v63  ;;  %v854_v29 = vadd.f32 %v853_v35, %v852_v60  ;;  %v855_v48 = vsel %vm167_vm0, %v784_v3, 0.0  ;;  %v857_v32 = vsel %vm167_vm0, %v788_v8, 0.0 }
  0xf7   :  { %v859_v7 = vsel %vm167_vm0, %v2833_v46, 0.0  ;;  %v860_v25 = vsel %vm167_vm0, %v781_v15, 0.0  ;;  %v862_v55 = vsel %vm167_vm0, %v785_v2, 0.0  ;;  %v864_v62 = vsel %vm167_vm0, %v789_v30, 0.0 }
  0xf8   :  { %1115 = vst [vmem:[#allocation9 + $0x3] sm:$0x1] %v1027_v26  ;;  %v856_v22 = vadd.f32 %v855_v48, %v854_v29  ;;  %v861_v59 = vadd.f32 %v860_v25, %v859_v7  ;;  %v866_v61 = vsel %vm167_vm0, %v2837_v56, 0.0  ;;  %v867_v13 = vsel %vm167_vm0, %v782_v6, 0.0 }
  0xf9   :  { %v868_v0 = vadd.f32 %v867_v13, %v866_v61  ;;  %v869_v20 = vsel %vm167_vm0, %v786_v19, 0.0  ;;  %v871_v54 = vsel %vm167_vm0, %v790_v45, 0.0  ;;  %v873_v46 = vsel %vm167_vm0, %v2841_v16, 0.0 }
  0xfa   :  { %v858_v15 = vadd.f32 %v857_v32, %v856_v22  ;;  %v863_v3 = vadd.f32 %v862_v55, %v861_v59  ;;  %v874_v2 = vsel %vm167_vm0, %v783_v12, 0.0  ;;  %v876_v63 = vsel %vm167_vm0, %v787_v40, 0.0 }
  0xfb   :  { %v870_v8 = vadd.f32 %v869_v20, %v868_v0  ;;  %v875_v30 = vadd.f32 %v874_v2, %v873_v46  ;;  %v878_v56 = vsel %vm167_vm0, %v791_v51, 0.0  ;;  %v2939_v6 = vmul.f32 %v2847_v52, %v2727_v31 }
  0xfc   :  { %v865_v19 = vadd.f32 %v864_v62, %v863_v3  ;;  %v952_v45 = vmul.f32 %v3376_v4, %v858_v15  ;;  %v956_v60 = vmul.f32 %v3381_v37, %v858_v15  ;;  %v960_v16 = vmul.f32 %v2847_v52, %v858_v15 }
  0xfd   :  { %v872_v35 = vadd.f32 %v871_v54, %v870_v8  ;;  %v877_v26 = vadd.f32 %v876_v63, %v875_v30  ;;  %v964_v12 = vmul.f32 %v2877_v14, %v858_v15  ;;  %v2947_v40 = vmul.f32 %v2847_v52, %v2731_v24 }
  0xfe   :  { %v953_v51 = vmul.f32 %v3378_v39, %v865_v19  ;;  %v1028_v29 = vsel %vm167_vm0, %v952_v45, 0.0  ;;  %v957_v48 = vmul.f32 %v3382_v53, %v865_v19  ;;  %v1035_v32 = vsel %vm167_vm0, %v956_v60, 0.0 }
  0xff   :  { %v879_v7 = vadd.f32 %v878_v56, %v877_v26  ;;  %v954_v25 = vmul.f32 %v3379_v43, %v872_v35  ;;  %v958_v55 = vmul.f32 %v3383_v38, %v872_v35  ;;  %v961_v62 = vmul.f32 %v2850_v11, %v865_v19 }
 0x100   :  { %v1029_v22 = vsel %vm167_vm0, %v953_v51, 0.0  ;;  %v1036_v59 = vsel %vm167_vm0, %v957_v48, 0.0  ;;  %v962_v61 = vmul.f32 %v2859_v28, %v872_v35  ;;  %v1042_v13 = vsel %vm167_vm0, %v960_v16, 0.0 }
 0x101   :  { %v955_v0 = vmul.f32 %v3380_v18, %v879_v7  ;;  %v1030_v20 = vadd.f32 %v1029_v22, %v1028_v29  ;;  %v1031_v54 = vsel %vm167_vm0, %v954_v25, 0.0  ;;  %v959_v46 = vmul.f32 %v2864_v23, %v879_v7 }
 0x102   :  { %v1037_v15 = vadd.f32 %v1036_v59, %v1035_v32  ;;  %v1038_v3 = vsel %vm167_vm0, %v958_v55, 0.0  ;;  %v963_v2 = vmul.f32 %v2868_v47, %v879_v7  ;;  %v1043_v63 = vsel %vm167_vm0, %v961_v62, 0.0 }
 0x103   :  { %v1032_v8 = vadd.f32 %v1031_v54, %v1030_v20  ;;  %v1033_v30 = vsel %vm167_vm0, %v955_v0, 0.0  ;;  %v1040_v56 = vsel %vm167_vm0, %v959_v46, 0.0  ;;  %v1044_v45 = vadd.f32 %v1043_v63, %v1042_v13 }
 0x104   :  { %v1039_v60 = vadd.f32 %v1038_v3, %v1037_v15  ;;  %v1045_v16 = vsel %vm167_vm0, %v962_v61, 0.0  ;;  %v1047_v26 = vsel %vm167_vm0, %v963_v2, 0.0  ;;  %v965_v51 = vmul.f32 %v2880_v50, %v865_v19 }
 0x105   :  { %v1034_v29 = vadd.f32 %v1033_v30, %v1032_v8  ;;  %v1046_v48 = vadd.f32 %v1045_v16, %v1044_v45  ;;  %v966_v32 = vmul.f32 %v2883_v17, %v872_v35  ;;  %v967_v25 = vmul.f32 %v2886_v9, %v879_v7 }
 0x106   :  { %v1041_v55 = vadd.f32 %v1040_v56, %v1039_v60  ;;  %v1049_v62 = vsel %vm167_vm0, %v964_v12, 0.0  ;;  %v1050_v22 = vsel %vm167_vm0, %v965_v51, 0.0  ;;  %v794_v59 = vmul.f32 %v2847_v52, %v2735_v1 }
 0x107   :  { %1116 = vst [vmem:[#allocation9 + $0x4] sm:$0x1] %v1034_v29  ;;  %v1048_v61 = vadd.f32 %v1047_v26, %v1046_v48  ;;  %v1051_v13 = vadd.f32 %v1050_v22, %v1049_v62  ;;  %v1052_v0 = vsel %vm167_vm0, %v966_v32, 0.0  ;;  %v1054_v19 = vsel %vm167_vm0, %v967_v25, 0.0 }
 0x108   :  { %1117 = vst [vmem:[#allocation9 + $0x5] sm:$0x1] %v1041_v55  ;;  %v795_v35 = vmul.f32 %v2847_v52, %v2739_v36  ;;  %v796_v7 = vmul.f32 %v2850_v11, %v2743_v42  ;;  %v797_v12 = vmul.f32 %v2850_v11, %v2747_v41  ;;  %v798_v20 = vmul.f32 %v2850_v11, %v2750_v49 }
 0x109   :  { %1118 = vst [vmem:[#allocation9 + $0x6] sm:$0x1] %v1048_v61  ;;  %v1053_v54 = vadd.f32 %v1052_v0, %v1051_v13  ;;  %v799_v46 = vmul.f32 %v2850_v11, %v2753_v34  ;;  %v800_v15 = vmul.f32 %v2859_v28, %v2756_v58  ;;  %v801_v3 = vmul.f32 %v2859_v28, %v2759_v10 }
 0x10a   :  { %v802_v2 = vmul.f32 %v2859_v28, %v2762_v57  ;;  %v803_v63 = vmul.f32 %v2859_v28, %v2765_v44  ;;  %v804_v8 = vmul.f32 %v2868_v47, %v2768_v21  ;;  %v805_v30 = vmul.f32 %v2868_v47, %v2771_v33 }
 0x10b   :  { %v1055_v56 = vadd.f32 %v1054_v19, %v1053_v54  ;;  %v806_v45 = vmul.f32 %v2868_v47, %v2774_v5  ;;  %v807_v60 = vmul.f32 %v2868_v47, %v2781_v27  ;;  %v880_v16 = vsel %vm167_vm0, %v2939_v6, 0.0 }
 0x10c   :  { %v881_v26 = vsel %vm167_vm0, %v796_v7, 0.0  ;;  %v883_v51 = vsel %vm167_vm0, %v800_v15, 0.0  ;;  %v885_v29 = vsel %vm167_vm0, %v804_v8, 0.0  ;;  %v887_v48 = vsel %vm167_vm0, %v2947_v40, 0.0 }
 0x10d   :  { %1119 = vst [vmem:[#allocation9 + $0x7] sm:$0x1] %v1055_v56  ;;  %v882_v32 = vadd.f32 %v881_v26, %v880_v16  ;;  %v888_v25 = vsel %vm167_vm0, %v797_v12, 0.0  ;;  %v890_v55 = vsel %vm167_vm0, %v801_v3, 0.0  ;;  %v892_v62 = vsel %vm167_vm0, %v805_v30, 0.0 }
 0x10e   :  { %v889_v22 = vadd.f32 %v888_v25, %v887_v48  ;;  %v894_v6 = vsel %vm167_vm0, %v794_v59, 0.0  ;;  %v895_v61 = vsel %vm167_vm0, %v798_v20, 0.0  ;;  %v897_v13 = vsel %vm167_vm0, %v802_v2, 0.0 }
 0x10f   :  { %v884_v0 = vadd.f32 %v883_v51, %v882_v32  ;;  %v896_v19 = vadd.f32 %v895_v61, %v894_v6  ;;  %v899_v7 = vsel %vm167_vm0, %v806_v45, 0.0  ;;  %v901_v40 = vsel %vm167_vm0, %v795_v35, 0.0 }
 0x110   :  { %v891_v54 = vadd.f32 %v890_v55, %v889_v22  ;;  %v902_v12 = vsel %vm167_vm0, %v799_v46, 0.0  ;;  %v904_v15 = vsel %vm167_vm0, %v803_v63, 0.0  ;;  %v906_v3 = vsel %vm167_vm0, %v807_v60, 0.0 }
 0x111   :  { %v886_v8 = vadd.f32 %v885_v29, %v884_v0  ;;  %v898_v30 = vadd.f32 %v897_v13, %v896_v19  ;;  %v903_v59 = vadd.f32 %v902_v12, %v901_v40  ;;  %v3025_v20 = vmul.f32 %v2877_v14, %v2727_v31 }
 0x112   :  { %v893_v2 = vadd.f32 %v892_v62, %v891_v54  ;;  %v3029_v56 = vmul.f32 %v2877_v14, %v2731_v24  ;;  %v3033_v35 = vmul.f32 %v2877_v14, %v2735_v1  ;;  %v3037_v46 = vmul.f32 %v2877_v14, %v2739_v36 }
 0x113   :  { %v900_v63 = vadd.f32 %v899_v7, %v898_v30  ;;  %v905_v45 = vadd.f32 %v904_v15, %v903_v59  ;;  %v968_v60 = vmul.f32 %v3376_v4, %v886_v8  ;;  %v972_v31 = vmul.f32 %v3381_v37, %v886_v8 }
 0x114   :  { %v969_v16 = vmul.f32 %v3378_v39, %v893_v2  ;;  %v973_v26 = vmul.f32 %v3382_v53, %v893_v2  ;;  %v976_v24 = vmul.f32 %v2847_v52, %v886_v8  ;;  %v977_v51 = vmul.f32 %v2850_v11, %v893_v2 }
 0x115   :  { %v907_v1 = vadd.f32 %v906_v3, %v905_v45  ;;  %v970_v29 = vmul.f32 %v3379_v43, %v900_v63  ;;  %v1056_v36 = vsel %vm167_vm0, %v968_v60, 0.0  ;;  %v974_v48 = vmul.f32 %v3383_v38, %v900_v63 }
 0x116   :  { %v1057_v32 = vsel %vm167_vm0, %v969_v16, 0.0  ;;  %v1063_v25 = vsel %vm167_vm0, %v972_v31, 0.0  ;;  %v1064_v55 = vsel %vm167_vm0, %v973_v26, 0.0  ;;  %v978_v62 = vmul.f32 %v2859_v28, %v900_v63 }
 0x117   :  { %v971_v22 = vmul.f32 %v3380_v18, %v907_v1  ;;  %v1058_v6 = vadd.f32 %v1057_v32, %v1056_v36  ;;  %v1059_v61 = vsel %vm167_vm0, %v970_v29, 0.0  ;;  %v975_v13 = vmul.f32 %v2864_v23, %v907_v1 }
 0x118   :  { %v1065_v0 = vadd.f32 %v1064_v55, %v1063_v25  ;;  %v1066_v19 = vsel %vm167_vm0, %v974_v48, 0.0  ;;  %v979_v7 = vmul.f32 %v2868_v47, %v907_v1  ;;  %v1070_v40 = vsel %vm167_vm0, %v976_v24, 0.0 }
 0x119   :  { %v1060_v54 = vadd.f32 %v1059_v61, %v1058_v6  ;;  %v1061_v12 = vsel %vm167_vm0, %v971_v22, 0.0  ;;  %v1068_v15 = vsel %vm167_vm0, %v975_v13, 0.0  ;;  %v1071_v3 = vsel %vm167_vm0, %v977_v51, 0.0 }
 0x11a   :  { %v1067_v30 = vadd.f32 %v1066_v19, %v1065_v0  ;;  %v1072_v59 = vadd.f32 %v1071_v3, %v1070_v40  ;;  %v1073_v45 = vsel %vm167_vm0, %v978_v62, 0.0  ;;  %v1075_v60 = vsel %vm167_vm0, %v979_v7, 0.0 }
 0x11b   :  { %v1062_v31 = vadd.f32 %v1061_v12, %v1060_v54  ;;  %v980_v16 = vmul.f32 %v2877_v14, %v886_v8  ;;  %v981_v26 = vmul.f32 %v2880_v50, %v893_v2  ;;  %v982_v24 = vmul.f32 %v2883_v17, %v900_v63 }
 0x11c   :  { %v1069_v29 = vadd.f32 %v1068_v15, %v1067_v30  ;;  %v1074_v36 = vadd.f32 %v1073_v45, %v1072_v59  ;;  %v983_v48 = vmul.f32 %v2886_v9, %v907_v1  ;;  %v812_v51 = vmul.f32 %v2880_v50, %v2743_v42 }
 0x11d   :  { %1120 = vst [vmem:[#allocation9 + $0x8] sm:$0x1] %v1062_v31  ;;  %v1077_v32 = vsel %vm167_vm0, %v980_v16, 0.0  ;;  %v1078_v25 = vsel %vm167_vm0, %v981_v26, 0.0  ;;  %v1080_v55 = vsel %vm167_vm0, %v982_v24, 0.0  ;;  %v813_v8 = vmul.f32 %v2880_v50, %v2747_v41 }
 0x11e   :  { %1121 = vst [vmem:[#allocation9 + $0x9] sm:$0x1] %v1069_v29  ;;  %v1076_v2 = vadd.f32 %v1075_v60, %v1074_v36  ;;  %v1079_v63 = vadd.f32 %v1078_v25, %v1077_v32  ;;  %v1082_v62 = vsel %vm167_vm0, %v983_v48, 0.0  ;;  %v814_v1 = vmul.f32 %v2880_v50, %v2750_v49 }
 0x11f   :  { %v815_v42 = vmul.f32 %v2880_v50, %v2753_v34  ;;  %v816_v22 = vmul.f32 %v2883_v17, %v2756_v58  ;;  %v817_v6 = vmul.f32 %v2883_v17, %v2759_v10  ;;  %v818_v41 = vmul.f32 %v2883_v17, %v2762_v57 }
 0x120   :  { %1122 = vst [vmem:[#allocation9 + $0xa] sm:$0x1] %v1076_v2  ;;  %v1081_v61 = vadd.f32 %v1080_v55, %v1079_v63  ;;  %v819_v13 = vmul.f32 %v2883_v17, %v2765_v44  ;;  %v820_v49 = vmul.f32 %v2886_v9, %v2768_v21  ;;  %v821_v34 = vmul.f32 %v2886_v9, %v2771_v33 }
 0x121   :  { %v822_v58 = vmul.f32 %v2886_v9, %v2774_v5  ;;  %v823_v10 = vmul.f32 %v2886_v9, %v2781_v27  ;;  %v908_v57 = vsel %vm167_vm0, %v3025_v20, 0.0  ;;  %v909_v0 = vsel %vm167_vm0, %v812_v51, 0.0 }
 0x122   :  { %v1083_v19 = vadd.f32 %v1082_v62, %v1081_v61  ;;  %v910_v7 = vadd.f32 %v909_v0, %v908_v57  ;;  %v911_v44 = vsel %vm167_vm0, %v816_v22, 0.0  ;;  %v913_v21 = vsel %vm167_vm0, %v820_v49, 0.0 }
 0x123   :  { %v915_v33 = vsel %vm167_vm0, %v3029_v56, 0.0  ;;  %v916_v40 = vsel %vm167_vm0, %v813_v8, 0.0  ;;  %v918_v5 = vsel %vm167_vm0, %v817_v6, 0.0  ;;  %v920_v27 = vsel %vm167_vm0, %v821_v34, 0.0 }
 0x124   :  { %1123 = vst [vmem:[#allocation9 + $0xb] sm:$0x1] %v1083_v19  ;;  %v912_v54 = vadd.f32 %v911_v44, %v910_v7  ;;  %v917_v20 = vadd.f32 %v916_v40, %v915_v33  ;;  %v922_v12 = vsel %vm167_vm0, %v3033_v35, 0.0  ;;  %v923_v15 = vsel %vm167_vm0, %v814_v1, 0.0 }
 0x125   :  { %v924_v3 = vadd.f32 %v923_v15, %v922_v12  ;;  %v925_v30 = vsel %vm167_vm0, %v818_v41, 0.0  ;;  %v927_v59 = vsel %vm167_vm0, %v822_v58, 0.0  ;;  %v929_v56 = vsel %vm167_vm0, %v3037_v46, 0.0 }
 0x126   :  { %v914_v45 = vadd.f32 %v913_v21, %v912_v54  ;;  %v919_v60 = vadd.f32 %v918_v5, %v917_v20  ;;  %v930_v31 = vsel %vm167_vm0, %v815_v42, 0.0  ;;  %v932_v16 = vsel %vm167_vm0, %v819_v13, 0.0 }
 0x127   :  { %v926_v26 = vadd.f32 %v925_v30, %v924_v3  ;;  %v931_v24 = vadd.f32 %v930_v31, %v929_v56  ;;  %v934_v35 = vsel %vm167_vm0, %v823_v10, 0.0 }
 0x128   :  { %v921_v29 = vadd.f32 %v920_v27, %v919_v60  ;;  %v984_v36 = vmul.f32 %v3376_v4, %v914_v45  ;;  %v988_v48 = vmul.f32 %v3381_v37, %v914_v45  ;;  %v992_v51 = vmul.f32 %v2847_v52, %v914_v45 }
 0x129   :  { %v928_v32 = vadd.f32 %v927_v59, %v926_v26  ;;  %v933_v25 = vadd.f32 %v932_v16, %v931_v24  ;;  %v996_v46 = vmul.f32 %v2877_v14, %v914_v45 }
 0x12a   :  { %v985_v55 = vmul.f32 %v3378_v39, %v921_v29  ;;  %v1084_v8 = vsel %vm167_vm0, %v984_v36, 0.0  ;;  %v989_v2 = vmul.f32 %v3382_v53, %v921_v29  ;;  %v1091_v63 = vsel %vm167_vm0, %v988_v48, 0.0 }
 0x12b   :  { %v935_v62 = vadd.f32 %v934_v35, %v933_v25  ;;  %v986_v1 = vmul.f32 %v3379_v43, %v928_v32  ;;  %v990_v4 = vmul.f32 %v3383_v38, %v928_v32  ;;  %v993_v37 = vmul.f32 %v2850_v11, %v921_v29 }
 0x12c   :  { %v1085_v52 = vsel %vm167_vm0, %v985_v55, 0.0  ;;  %v1092_v42 = vsel %vm167_vm0, %v989_v2, 0.0  ;;  %v994_v14 = vmul.f32 %v2859_v28, %v928_v32  ;;  %v1098_v39 = vsel %vm167_vm0, %v992_v51, 0.0 }
 0x12d   :  { %v987_v22 = vmul.f32 %v3380_v18, %v935_v62  ;;  %v1086_v53 = vadd.f32 %v1085_v52, %v1084_v8  ;;  %v1087_v6 = vsel %vm167_vm0, %v986_v1, 0.0  ;;  %v991_v41 = vmul.f32 %v2864_v23, %v935_v62 }
 0x12e   :  { %v1093_v43 = vadd.f32 %v1092_v42, %v1091_v63  ;;  %v1094_v38 = vsel %vm167_vm0, %v990_v4, 0.0  ;;  %v995_v11 = vmul.f32 %v2868_v47, %v935_v62  ;;  %v1099_v61 = vsel %vm167_vm0, %v993_v37, 0.0 }
 0x12f   :  { %v1088_v13 = vadd.f32 %v1087_v6, %v1086_v53  ;;  %v1089_v49 = vsel %vm167_vm0, %v987_v22, 0.0  ;;  %v1096_v28 = vsel %vm167_vm0, %v991_v41, 0.0  ;;  %v1100_v34 = vadd.f32 %v1099_v61, %v1098_v39 }
 0x130   :  { %v1095_v58 = vadd.f32 %v1094_v38, %v1093_v43  ;;  %v1101_v18 = vsel %vm167_vm0, %v994_v14, 0.0  ;;  %v1103_v10 = vsel %vm167_vm0, %v995_v11, 0.0  ;;  %v997_v23 = vmul.f32 %v2880_v50, %v921_v29 }
 0x131   :  { %v1090_v57 = vadd.f32 %v1089_v49, %v1088_v13  ;;  %v1102_v0 = vadd.f32 %v1101_v18, %v1100_v34  ;;  %v998_v19 = vmul.f32 %v2883_v17, %v928_v32  ;;  %v999_v47 = vmul.f32 %v2886_v9, %v935_v62 }
 0x132   :  { %v1097_v7 = vadd.f32 %v1096_v28, %v1095_v58  ;;  %v1105_v44 = vsel %vm167_vm0, %v996_v46, 0.0  ;;  %v1106_v21 = vsel %vm167_vm0, %v997_v23, 0.0 }
 0x133   :  { %1124 = vst [vmem:[#allocation9 + $0xc] sm:$0x1] %v1090_v57  ;;  %v1104_v33 = vadd.f32 %v1103_v10, %v1102_v0  ;;  %v1107_v40 = vadd.f32 %v1106_v21, %v1105_v44  ;;  %v1108_v5 = vsel %vm167_vm0, %v998_v19, 0.0  ;;  %v1110_v27 = vsel %vm167_vm0, %v999_v47, 0.0 }
 0x134   :  { %1125 = vst [vmem:[#allocation9 + $0xd] sm:$0x1] %v1097_v7 }
 0x135   :  { %1126 = vst [vmem:[#allocation9 + $0xe] sm:$0x1] %v1104_v33  ;;  %v1109_v50 = vadd.f32 %v1108_v5, %v1107_v40 }
 0x137   :  { %v1111_v17 = vadd.f32 %v1110_v27, %v1109_v50 }
 0x139   :  { %1127 = vst [vmem:[#allocation9 + $0xf] sm:$0x1] %v1111_v17 }
 0x13a   :  { %1316 = shalt.err (!%p1313_p8)
}
 0x13b   :  { %s1317_s15 = scalar_lea.hbm %s3166_s4, 256 }
 0x13c   :  { %p1318_p9 = scmp.ne.s32.totalorder %s3166_s4, %s1317_s15  ;;  %p1321_p10 = scmp.lt.u32.totalorder %s1317_s15, %s3166_s4 }
 0x13e   :  { %p1323_p11 = pnand %p1321_p10, %p1318_p9 }
 0x140   :  { %1326 = shalt.err (!%p1323_p11)
}
 0x141   :  { %1151 = dma.vmem_to_hbm [thread:$0]  %s1146_s12, 256, %s3166_s4, [#allocation10], %s1337_s27, %s1337_s27, %s1338_s28  }
 0x142   :  { %1331 = dma.done.wait [#allocation4], 256  }
 0x143   :  { %1332 = vsyncadd [#allocation4], 4294967040 }
 0x144   :  { %1333 = dma.done.wait [#allocation10], 256  }
 0x145   :  { %1334 = vsyncadd [#allocation10], 4294967040 }
 0x146   :  { %1158 = vsyncpa [#allocation3], 1 }
 0x147   :  { %1159 = vsyncpa [#allocation6], 1 }
 0x148   :  { %1160 = vsyncpa [#allocation4], 1 }
 0x149   :  { %1161 = vsyncpa [#allocation10], 1 }

</bundles_post_ra>
